<compile_context>
chip_gen: v6e
topology: v6e:2x2x1
jax: 0.10.0
libtpu: 0.0.40
codegen_flags: <defaults>
</compile_context>

<pallas_src>
import numpy as np
import jax
import jax.numpy as jnp
from jax import lax
from jax.experimental import pallas as pl
from jax.experimental.pallas import tpu as pltpu


# ------------------------------ layout helpers ------------------------------

def _round_up(x, m):
    return (x + m - 1) // m * m


def _stage2_dims(H, W):
    """Row-pitch layout constants for the pooled map / conv2 stage.

    Pooled pixel (ho, wo) lives at row (ho+1)*WP2 + (wo+1) of a zero-padded map;
    conv2 output (h2, w2) is computed at row h2*WP2 + w2, tap (kh,kw) reads the
    window starting at kh*WP2 + kw.  Sizes verified at H = W = 16."""
    HO, WO = H // 2, W // 2
    WP2 = _round_up(WO + 2, 8)                               # row pitch (16 at 16x16)
    GAP_ROWS = _round_up((HO - 2) * WP2 + WO - 1, 8)         # pool-2 anchor window
    R2 = _round_up(max((HO - 1) * WP2 + WO, GAP_ROWS + WP2 + 1), 8)  # conv2 rows
    X2ROWS = _round_up(2 * WP2 + 2 + R2, 8)                  # padded map rows
    return HO, WO, WP2, GAP_ROWS, R2, X2ROWS


# ------------------------------- fused kernel -------------------------------

def _make_kernel(C1, C2, Q, HO, WO, WP2, GAP_ROWS, R2, X2ROWS):
    HWIN = GAP_ROWS + WP2        # rows needed by the horizontal max of pool #2

    def kernel(x1_ref, w1_ref, b1_ref, w2_ref, b2_ref, gapfc_ref, bfc_ref,
               out_ref, x2s_ref, x2cat_ref):
        # Zero-padding ring of the conv2 input must be zero on EVERY grid step
        # (scratch persists across iterations / per TensorCore).
        x2s_ref[...] = jnp.zeros((X2ROWS, C1), jnp.float32)

        # ---- stage 1: conv1 (+ folded BN) + ReLU, one K-dense MXU dot ----
        y1 = jnp.dot(x1_ref[...], w1_ref[...], preferred_element_type=jnp.float32)
        y1 = jnp.maximum(y1 + b1_ref[...], 0.0)                       # (4Q, C1)

        # ---- fused 2x2 max-pool #1: four aligned, contiguous slabs ----
        pooled = jnp.maximum(jnp.maximum(y1[0:Q, :], y1[Q:2 * Q, :]),
                             jnp.maximum(y1[2 * Q:3 * Q, :], y1[3 * Q:4 * Q, :]))

        # scatter pooled rows into the zero-padded, row-pitched conv2 input layout
        for ho in range(HO):
            dst = (ho + 1) * WP2 + 1
            x2s_ref[dst:dst + WO, :] = pooled[ho * WO:(ho + 1) * WO, :]

        # ---- stage 2: conv2 (+ folded BN) + ReLU, one K = 9*C1 dot ----
        for k in range(9):
            off = (k // 3) * WP2 + (k % 3)
            x2cat_ref[:, k * C1:(k + 1) * C1] = (
                x2s_ref[off:off + R2, :].astype(jnp.bfloat16))
        y2 = jnp.dot(x2cat_ref[...], w2_ref[...],
                     preferred_element_type=jnp.float32)
        y2 = jnp.maximum(y2 + b2_ref[...], 0.0)                       # (R2, C2)

        # ---- fused 2x2 max-pool #2 + global-avg-pool + FC (masked reduction) ----
        hmax = jnp.maximum(y2[0:HWIN, :], y2[1:HWIN + 1, :])          # horizontal
        vmax = jnp.maximum(hmax[0:GAP_ROWS, :], hmax[WP2:HWIN, :])    # vertical (aligned)
        g = jnp.sum(vmax * gapfc_ref[...], axis=0, keepdims=True)     # (1, C2)
        # TODO(synk): dropout is identity in eval mode; training-mode dropout not implemented.
        val = jnp.sum(g, axis=1, keepdims=True) + bfc_ref[...]        # (1, 1)
        out_ref[...] = jnp.broadcast_to(val.reshape(1, 1, 1), (1, 8, 128))

    return kernel


# ------------------------------- JAX wrapper --------------------------------

def _fuse_bn_into_conv(w_torch, b_conv, gamma, beta, mean, var, eps=1e-5):
    """Fold conv bias + eval-mode BatchNorm into the conv weights / bias.

    Returns (w_mat, bias): w_mat is (9*Cin, Cout) with row index
    (kh*3 + kw)*Cin + cin, matching the im2col / tap-concat column order."""
    scale = gamma / jnp.sqrt(var + eps)
    bias = (b_conv - mean) * scale + beta
    cout, cin = w_torch.shape[0], w_torch.shape[1]
    w_mat = jnp.transpose(w_torch, (2, 3, 1, 0)).reshape(9 * cin, cout)
    w_mat = w_mat * scale.reshape(1, cout)
    return w_mat, bias.reshape(1, cout)


@jax.jit
def forward_pallas(x_nchw, p):
    N, CIN, H, W = x_nchw.shape
    assert H % 4 == 0 and W % 4 == 0, "need two clean 2x2 max-pools"
    C1 = p["bn1_gamma"].shape[0]
    C2 = p["bn2_gamma"].shape[0]
    HO, WO, WP2, GAP_ROWS, R2, X2ROWS = _stage2_dims(H, W)
    Q = HO * WO                      # pooled positions after pool #1
    K1 = 9 * CIN
    K1P = _round_up(K1, 8)           # 27 -> 32 lanes (lane-dense-ish, K-padded)

    # ---- wrapper-side im2col for conv1; rows grouped into 4 pool slabs ----
    x_nhwc = jnp.transpose(x_nchw, (0, 2, 3, 1)).astype(jnp.float32)
    xp = jnp.pad(x_nhwc, ((0, 0), (1, 1), (1, 1), (0, 0)))
    patches = jnp.concatenate(
        [xp[:, dh:dh + H, dw:dw + W, :] for dh in range(3) for dw in range(3)],
        axis=-1)                                            # (N, H, W, 9*CIN)
    pat = patches.reshape(N, HO, 2, WO, 2, K1)
    pat = jnp.transpose(pat, (0, 2, 4, 1, 3, 5))            # (N, hr, wr, ho, wo, k)
    pat = pat.reshape(N, H * W, K1)
    x1 = jnp.pad(pat, ((0, 0), (0, 0), (0, K1P - K1)))
    x1 = x1.reshape(N * H * W, K1P).astype(jnp.bfloat16)

    # ---- weights with BN scale folded in; bf16 matmul operands ----
    w1m, b1 = _fuse_bn_into_conv(p["w1"], p["b1"], p["bn1_gamma"], p["bn1_beta"],
                                 p["bn1_mean"], p["bn1_var"])
    w2m, b2 = _fuse_bn_into_conv(p["w2"], p["b2"], p["bn2_gamma"], p["bn2_beta"],
                                 p["bn2_mean"], p["bn2_var"])
    w1m = jnp.pad(w1m, ((0, K1P - K1), (0, 0))).astype(jnp.bfloat16)   # (K1P, C1)
    w2m = w2m.astype(jnp.bfloat16)                                     # (9*C1, C2)

    # ---- pool#2 anchors * (fc weight / num positions): GAP + FC in one mask ----
    gm = np.zeros((GAP_ROWS, 1), np.float32)
    for po in range(HO // 2):
        for qo in range(WO // 2):
            gm[(2 * po) * WP2 + 2 * qo, 0] = 1.0 / ((HO // 2) * (WO // 2))
    gapfc = jnp.asarray(gm) * p["fc_w"].astype(jnp.float32)            # (GAP_ROWS, C2)
    bfc = p["fc_b"].reshape(1, 1).astype(jnp.float32)

    kernel = _make_kernel(C1, C2, Q, HO, WO, WP2, GAP_ROWS, R2, X2ROWS)

    flops = N * (2 * H * W * K1P * C1 + 2 * R2 * 9 * C1 * C2)
    bytes_accessed = sum(int(np.prod(a.shape)) * a.dtype.itemsize
                         for a in (x1, w1m, b1, w2m, b2, gapfc, bfc))
    bytes_accessed += N * 8 * 128 * 4

    out3 = pl.pallas_call(
        kernel,
        out_shape=jax.ShapeDtypeStruct((N, 8, 128), jnp.float32),
        grid_spec=pltpu.PrefetchScalarGridSpec(
            num_scalar_prefetch=0,
            grid=(N,),
            in_specs=[
                pl.BlockSpec((H * W, K1P), lambda b: (b, 0)),      # im2col'd input
                pl.BlockSpec((K1P, C1), lambda b: (0, 0)),         # conv1 weights (BN folded)
                pl.BlockSpec((1, C1), lambda b: (0, 0)),           # conv1/bn1 bias
                pl.BlockSpec((9 * C1, C2), lambda b: (0, 0)),      # conv2 weights (BN folded)
                pl.BlockSpec((1, C2), lambda b: (0, 0)),           # conv2/bn2 bias
                pl.BlockSpec((GAP_ROWS, C2), lambda b: (0, 0)),    # gap+fc mask
                pl.BlockSpec((1, 1), lambda b: (0, 0)),            # fc bias
            ],
            out_specs=pl.BlockSpec((1, 8, 128), lambda b: (b, 0, 0)),
            scratch_shapes=[
                pltpu.VMEM((X2ROWS, C1), jnp.float32),    # zero-padded pooled map
                pltpu.VMEM((R2, 9 * C1), jnp.bfloat16),   # conv2 K-dense LHS (im2col)
            ],
        ),
        compiler_params=pltpu.CompilerParams(dimension_semantics=("parallel",)),
        cost_estimate=pl.CostEstimate(flops=flops, transcendentals=0,
                                      bytes_accessed=bytes_accessed),
    )(x1, w1m, b1, w2m, b2, gapfc, bfc)

    return out3[:, 0, :1]                                  # (N, 1)


# --------------------------- parameters / reference -------------------------

def init_params(key):
    """Deterministic synthetic parameters matching the PyTorch module shapes."""
    ks = jax.random.split(key, 12)
    p = {}
    p["w1"] = 0.1 * jax.random.normal(ks[0], (32, 3, 3, 3), jnp.float32)
    p["b1"] = 0.1 * jax.random.normal(ks[1], (32,), jnp.float32)
    p["bn1_gamma"] = 1.0 + 0.1 * jax.random.normal(ks[2], (32,), jnp.float32)
    p["bn1_beta"] = 0.1 * jax.random.normal(ks[3], (32,), jnp.float32)
    p["bn1_mean"] = 0.1 * jax.random.normal(ks[4], (32,), jnp.float32)
    p["bn1_var"] = jax.random.uniform(ks[5], (32,), jnp.float32, 0.5, 1.5)
    p["w2"] = 0.05 * jax.random.normal(ks[6], (64, 32, 3, 3), jnp.float32)
    p["b2"] = 0.1 * jax.random.normal(ks[7], (64,), jnp.float32)
    p["bn2_gamma"] = 1.0 + 0.1 * jax.random.normal(ks[8], (64,), jnp.float32)
    p["bn2_beta"] = 0.1 * jax.random.normal(ks[9], (64,), jnp.float32)
    p["bn2_mean"] = 0.1 * jax.random.normal(ks[10], (64,), jnp.float32)
    p["bn2_var"] = jax.random.uniform(ks[11], (64,), jnp.float32, 0.5, 1.5)
    kf1, kf2 = jax.random.split(jax.random.fold_in(key, 99))
    p["fc_w"] = 0.1 * jax.random.normal(kf1, (1, 64), jnp.float32)  # torch (out, in)
    p["fc_b"] = 0.1 * jax.random.normal(kf2, (1,), jnp.float32)
    return p


def forward_reference(x_nchw, p):
    x = jnp.transpose(x_nchw, (0, 2, 3, 1)).astype(jnp.float32)
    dn = ("NHWC", "HWIO", "NHWC")

    def stage(x, w_t, b, g, bt, m, v):
        w = jnp.transpose(w_t, (2, 3, 1, 0))
        y = lax.conv_general_dilated(x, w, (1, 1), "SAME", dimension_numbers=dn,
                                     precision=lax.Precision.HIGHEST) + b
        y = g * (y - m) / jnp.sqrt(v + 1e-5) + bt
        y = jnp.maximum(y, 0.0)
        return lax.reduce_window(y, -jnp.inf, lax.max, (1, 2, 2, 1),
                                 (1, 2, 2, 1), "VALID")

    x = stage(x, p["w1"], p["b1"], p["bn1_gamma"], p["bn1_beta"],
              p["bn1_mean"], p["bn1_var"])
    x = stage(x, p["w2"], p["b2"], p["bn2_gamma"], p["bn2_beta"],
              p["bn2_mean"], p["bn2_var"])
    x = jnp.mean(x, axis=(1, 2))
    return x @ p["fc_w"].T + p["fc_b"]


# ---------------------------------- main -------------------------------------

if __name__ == "__main__":
    key = jax.random.PRNGKey(0)
    kx, kp = jax.random.split(key)
    x = jax.random.normal(kx, (2, 3, 16, 16), jnp.float32)   # NCHW, like PyTorch
    params = init_params(kp)

    out = jax.block_until_ready(forward_pallas(x, params))
    assert out.shape == (2, 1), out.shape

    ref = jax.block_until_ready(forward_reference(x, params))
    assert jnp.allclose(out, ref, rtol=1e-2, atol=2e-2), (out, ref)

    print("KERNEL_OK")
</pallas_src>

<mosaic_0001>
module attributes {stable_mosaic.version = 11 : i64} {
  func.func @kernel(%arg0: i32, %arg1: memref<256x32xbf16, #tpu.memory_space<vmem>>, %arg2: memref<32x32xbf16, #tpu.memory_space<vmem>>, %arg3: memref<1x32xf32, #tpu.memory_space<vmem>>, %arg4: memref<288x64xbf16, #tpu.memory_space<vmem>>, %arg5: memref<1x64xf32, #tpu.memory_space<vmem>>, %arg6: memref<104x64xf32, #tpu.memory_space<vmem>>, %arg7: memref<1x1xf32, #tpu.memory_space<vmem>>, %arg8: memref<1x8x128xf32, #tpu.memory_space<vmem>>, %arg9: memref<168x32xf32, #tpu.memory_space<vmem>>, %arg10: memref<128x288xbf16, #tpu.memory_space<vmem>>) attributes {dimension_semantics = [#tpu.dimension_semantics<parallel>], iteration_bounds = array<i64: 2>, scalar_prefetch = 0 : i64, scratch_operands = 2 : i64, tpu.core_type = #tpu.core_type<tc>, window_params = [{transform_indices = @transform_0, window_bounds = array<i64: 256, 32>}, {pipeline_mode = #tpu.pipeline_mode<synchronous>, transform_indices = @transform_1, window_bounds = array<i64: 32, 32>}, {pipeline_mode = #tpu.pipeline_mode<synchronous>, transform_indices = @transform_2, window_bounds = array<i64: 1, 32>}, {pipeline_mode = #tpu.pipeline_mode<synchronous>, transform_indices = @transform_3, window_bounds = array<i64: 288, 64>}, {pipeline_mode = #tpu.pipeline_mode<synchronous>, transform_indices = @transform_4, window_bounds = array<i64: 1, 64>}, {pipeline_mode = #tpu.pipeline_mode<synchronous>, transform_indices = @transform_5, window_bounds = array<i64: 104, 64>}, {pipeline_mode = #tpu.pipeline_mode<synchronous>, transform_indices = @transform_6, window_bounds = array<i64: 1, 1>}, {transform_indices = @transform_7, window_bounds = array<i64: 1, 8, 128>}]} {
    %cst = arith.constant 0.000000e+00 : f32
    %0 = vector.broadcast %cst : f32 to vector<168x32xf32>
    %c0 = arith.constant 0 : index
    %c0_0 = arith.constant 0 : index
    %1 = vector.load %arg9[%c0, %c0_0] : memref<168x32xf32, #tpu.memory_space<vmem>>, vector<168x32xf32>
    tpu.vector_store %arg9[%c0, %c0_0], %0 {strides = array<i32>} : memref<168x32xf32, #tpu.memory_space<vmem>>, vector<168x32xf32>,
    %c0_1 = arith.constant 0 : index
    %c0_2 = arith.constant 0 : index
    %2 = vector.load %arg1[%c0_1, %c0_2] : memref<256x32xbf16, #tpu.memory_space<vmem>>, vector<256x32xbf16>
    %c0_3 = arith.constant 0 : index
    %c0_4 = arith.constant 0 : index
    %3 = vector.load %arg2[%c0_3, %c0_4] : memref<32x32xbf16, #tpu.memory_space<vmem>>, vector<32x32xbf16>
    %cst_5 = arith.constant dense<0.000000e+00> : vector<256x32xf32>
    %4 = tpu.matmul %2, %3, %cst_5 {dimension_numbers = #tpu.dot_dimension_numbers<[1], [0], [0], [1], [0, 0, 1, 1], [], []>} : vector<256x32xbf16>, vector<32x32xbf16>, vector<256x32xf32> -> vector<256x32xf32>
    %c0_6 = arith.constant 0 : index
    %c0_7 = arith.constant 0 : index
    %5 = vector.load %arg3[%c0_6, %c0_7] : memref<1x32xf32, #tpu.memory_space<vmem>>, vector<1x32xf32>
    %6 = vector.broadcast %5 : vector<1x32xf32> to vector<256x32xf32>
    %7 = arith.addf %4, %6 : vector<256x32xf32>
    %cst_8 = arith.constant 0.000000e+00 : f32
    %8 = vector.broadcast %cst_8 : f32 to vector<256x32xf32>
    %9 = arith.maximumf %7, %8 : vector<256x32xf32>
    %10 = vector.extract_strided_slice %9 {offsets = [0, 0], sizes = [64, 32], strides = [1, 1]} : vector<256x32xf32> to vector<64x32xf32>
    %11 = vector.extract_strided_slice %9 {offsets = [64, 0], sizes = [64, 32], strides = [1, 1]} : vector<256x32xf32> to vector<64x32xf32>
    %12 = arith.maximumf %10, %11 : vector<64x32xf32>
    %13 = vector.extract_strided_slice %9 {offsets = [128, 0], sizes = [64, 32], strides = [1, 1]} : vector<256x32xf32> to vector<64x32xf32>
    %14 = vector.extract_strided_slice %9 {offsets = [192, 0], sizes = [64, 32], strides = [1, 1]} : vector<256x32xf32> to vector<64x32xf32>
    %15 = arith.maximumf %13, %14 : vector<64x32xf32>
    %16 = arith.maximumf %12, %15 : vector<64x32xf32>
    %17 = vector.extract_strided_slice %16 {offsets = [0, 0], sizes = [8, 32], strides = [1, 1]} : vector<64x32xf32> to vector<8x32xf32>
    %c17 = arith.constant 17 : index
    %c0_9 = arith.constant 0 : index
    %18 = vector.load %arg9[%c17, %c0_9] : memref<168x32xf32, #tpu.memory_space<vmem>>, vector<8x32xf32>
    tpu.vector_store %arg9[%c17, %c0_9], %17 {strides = array<i32>} : memref<168x32xf32, #tpu.memory_space<vmem>>, vector<8x32xf32>,
    %19 = vector.extract_strided_slice %16 {offsets = [8, 0], sizes = [8, 32], strides = [1, 1]} : vector<64x32xf32> to vector<8x32xf32>
    %c33 = arith.constant 33 : index
    %c0_10 = arith.constant 0 : index
    %20 = vector.load %arg9[%c33, %c0_10] : memref<168x32xf32, #tpu.memory_space<vmem>>, vector<8x32xf32>
    tpu.vector_store %arg9[%c33, %c0_10], %19 {strides = array<i32>} : memref<168x32xf32, #tpu.memory_space<vmem>>, vector<8x32xf32>,
    %21 = vector.extract_strided_slice %16 {offsets = [16, 0], sizes = [8, 32], strides = [1, 1]} : vector<64x32xf32> to vector<8x32xf32>
    %c49 = arith.constant 49 : index
    %c0_11 = arith.constant 0 : index
    %22 = vector.load %arg9[%c49, %c0_11] : memref<168x32xf32, #tpu.memory_space<vmem>>, vector<8x32xf32>
    tpu.vector_store %arg9[%c49, %c0_11], %21 {strides = array<i32>} : memref<168x32xf32, #tpu.memory_space<vmem>>, vector<8x32xf32>,
    %23 = vector.extract_strided_slice %16 {offsets = [24, 0], sizes = [8, 32], strides = [1, 1]} : vector<64x32xf32> to vector<8x32xf32>
    %c65 = arith.constant 65 : index
    %c0_12 = arith.constant 0 : index
    %24 = vector.load %arg9[%c65, %c0_12] : memref<168x32xf32, #tpu.memory_space<vmem>>, vector<8x32xf32>
    tpu.vector_store %arg9[%c65, %c0_12], %23 {strides = array<i32>} : memref<168x32xf32, #tpu.memory_space<vmem>>, vector<8x32xf32>,
    %25 = vector.extract_strided_slice %16 {offsets = [32, 0], sizes = [8, 32], strides = [1, 1]} : vector<64x32xf32> to vector<8x32xf32>
    %c81 = arith.constant 81 : index
    %c0_13 = arith.constant 0 : index
    %26 = vector.load %arg9[%c81, %c0_13] : memref<168x32xf32, #tpu.memory_space<vmem>>, vector<8x32xf32>
    tpu.vector_store %arg9[%c81, %c0_13], %25 {strides = array<i32>} : memref<168x32xf32, #tpu.memory_space<vmem>>, vector<8x32xf32>,
    %27 = vector.extract_strided_slice %16 {offsets = [40, 0], sizes = [8, 32], strides = [1, 1]} : vector<64x32xf32> to vector<8x32xf32>
    %c97 = arith.constant 97 : index
    %c0_14 = arith.constant 0 : index
    %28 = vector.load %arg9[%c97, %c0_14] : memref<168x32xf32, #tpu.memory_space<vmem>>, vector<8x32xf32>
    tpu.vector_store %arg9[%c97, %c0_14], %27 {strides = array<i32>} : memref<168x32xf32, #tpu.memory_space<vmem>>, vector<8x32xf32>,
    %29 = vector.extract_strided_slice %16 {offsets = [48, 0], sizes = [8, 32], strides = [1, 1]} : vector<64x32xf32> to vector<8x32xf32>
    %c113 = arith.constant 113 : index
    %c0_15 = arith.constant 0 : index
    %30 = vector.load %arg9[%c113, %c0_15] : memref<168x32xf32, #tpu.memory_space<vmem>>, vector<8x32xf32>
    tpu.vector_store %arg9[%c113, %c0_15], %29 {strides = array<i32>} : memref<168x32xf32, #tpu.memory_space<vmem>>, vector<8x32xf32>,
    %31 = vector.extract_strided_slice %16 {offsets = [56, 0], sizes = [8, 32], strides = [1, 1]} : vector<64x32xf32> to vector<8x32xf32>
    %c129 = arith.constant 129 : index
    %c0_16 = arith.constant 0 : index
    %32 = vector.load %arg9[%c129, %c0_16] : memref<168x32xf32, #tpu.memory_space<vmem>>, vector<8x32xf32>
    tpu.vector_store %arg9[%c129, %c0_16], %31 {strides = array<i32>} : memref<168x32xf32, #tpu.memory_space<vmem>>, vector<8x32xf32>,
    %c0_17 = arith.constant 0 : index
    %c0_18 = arith.constant 0 : index
    %33 = vector.load %arg9[%c0_17, %c0_18] : memref<168x32xf32, #tpu.memory_space<vmem>>, vector<128x32xf32>
    %34 = arith.truncf %33 : vector<128x32xf32> to vector<128x32xbf16>
    %c0_19 = arith.constant 0 : index
    %c0_20 = arith.constant 0 : index
    %35 = vector.load %arg10[%c0_19, %c0_20] : memref<128x288xbf16, #tpu.memory_space<vmem>>, vector<128x32xbf16>
    tpu.vector_store %arg10[%c0_19, %c0_20], %34 {strides = array<i32>} : memref<128x288xbf16, #tpu.memory_space<vmem>>, vector<128x32xbf16>,
    %c1 = arith.constant 1 : index
    %c0_21 = arith.constant 0 : index
    %36 = vector.load %arg9[%c1, %c0_21] : memref<168x32xf32, #tpu.memory_space<vmem>>, vector<128x32xf32>
    %37 = arith.truncf %36 : vector<128x32xf32> to vector<128x32xbf16>
    %c0_22 = arith.constant 0 : index
    %c32 = arith.constant 32 : index
    %38 = vector.load %arg10[%c0_22, %c32] : memref<128x288xbf16, #tpu.memory_space<vmem>>, vector<128x32xbf16>
    tpu.vector_store %arg10[%c0_22, %c32], %37 {strides = array<i32>} : memref<128x288xbf16, #tpu.memory_space<vmem>>, vector<128x32xbf16>,
    %c2 = arith.constant 2 : index
    %c0_23 = arith.constant 0 : index
    %39 = vector.load %arg9[%c2, %c0_23] : memref<168x32xf32, #tpu.memory_space<vmem>>, vector<128x32xf32>
    %40 = arith.truncf %39 : vector<128x32xf32> to vector<128x32xbf16>
    %c0_24 = arith.constant 0 : index
    %c64 = arith.constant 64 : index
    %41 = vector.load %arg10[%c0_24, %c64] : memref<128x288xbf16, #tpu.memory_space<vmem>>, vector<128x32xbf16>
    tpu.vector_store %arg10[%c0_24, %c64], %40 {strides = array<i32>} : memref<128x288xbf16, #tpu.memory_space<vmem>>, vector<128x32xbf16>,
    %c16 = arith.constant 16 : index
    %c0_25 = arith.constant 0 : index
    %42 = vector.load %arg9[%c16, %c0_25] : memref<168x32xf32, #tpu.memory_space<vmem>>, vector<128x32xf32>
    %43 = arith.truncf %42 : vector<128x32xf32> to vector<128x32xbf16>
    %c0_26 = arith.constant 0 : index
    %c96 = arith.constant 96 : index
    %44 = vector.load %arg10[%c0_26, %c96] : memref<128x288xbf16, #tpu.memory_space<vmem>>, vector<128x32xbf16>
    tpu.vector_store %arg10[%c0_26, %c96], %43 {strides = array<i32>} : memref<128x288xbf16, #tpu.memory_space<vmem>>, vector<128x32xbf16>,
    %c17_27 = arith.constant 17 : index
    %c0_28 = arith.constant 0 : index
    %45 = vector.load %arg9[%c17_27, %c0_28] : memref<168x32xf32, #tpu.memory_space<vmem>>, vector<128x32xf32>
    %46 = arith.truncf %45 : vector<128x32xf32> to vector<128x32xbf16>
    %c0_29 = arith.constant 0 : index
    %c128 = arith.constant 128 : index
    %47 = vector.load %arg10[%c0_29, %c128] : memref<128x288xbf16, #tpu.memory_space<vmem>>, vector<128x32xbf16>
    tpu.vector_store %arg10[%c0_29, %c128], %46 {strides = array<i32>} : memref<128x288xbf16, #tpu.memory_space<vmem>>, vector<128x32xbf16>,
    %c18 = arith.constant 18 : index
    %c0_30 = arith.constant 0 : index
    %48 = vector.load %arg9[%c18, %c0_30] : memref<168x32xf32, #tpu.memory_space<vmem>>, vector<128x32xf32>
    %49 = arith.truncf %48 : vector<128x32xf32> to vector<128x32xbf16>
    %c0_31 = arith.constant 0 : index
    %c160 = arith.constant 160 : index
    %50 = vector.load %arg10[%c0_31, %c160] : memref<128x288xbf16, #tpu.memory_space<vmem>>, vector<128x32xbf16>
    tpu.vector_store %arg10[%c0_31, %c160], %49 {strides = array<i32>} : memref<128x288xbf16, #tpu.memory_space<vmem>>, vector<128x32xbf16>,
    %c32_32 = arith.constant 32 : index
    %c0_33 = arith.constant 0 : index
    %51 = vector.load %arg9[%c32_32, %c0_33] : memref<168x32xf32, #tpu.memory_space<vmem>>, vector<128x32xf32>
    %52 = arith.truncf %51 : vector<128x32xf32> to vector<128x32xbf16>
    %c0_34 = arith.constant 0 : index
    %c192 = arith.constant 192 : index
    %53 = vector.load %arg10[%c0_34, %c192] : memref<128x288xbf16, #tpu.memory_space<vmem>>, vector<128x32xbf16>
    tpu.vector_store %arg10[%c0_34, %c192], %52 {strides = array<i32>} : memref<128x288xbf16, #tpu.memory_space<vmem>>, vector<128x32xbf16>,
    %c33_35 = arith.constant 33 : index
    %c0_36 = arith.constant 0 : index
    %54 = vector.load %arg9[%c33_35, %c0_36] : memref<168x32xf32, #tpu.memory_space<vmem>>, vector<128x32xf32>
    %55 = arith.truncf %54 : vector<128x32xf32> to vector<128x32xbf16>
    %c0_37 = arith.constant 0 : index
    %c224 = arith.constant 224 : index
    %56 = vector.load %arg10[%c0_37, %c224] : memref<128x288xbf16, #tpu.memory_space<vmem>>, vector<128x32xbf16>
    tpu.vector_store %arg10[%c0_37, %c224], %55 {strides = array<i32>} : memref<128x288xbf16, #tpu.memory_space<vmem>>, vector<128x32xbf16>,
    %c34 = arith.constant 34 : index
    %c0_38 = arith.constant 0 : index
    %57 = vector.load %arg9[%c34, %c0_38] : memref<168x32xf32, #tpu.memory_space<vmem>>, vector<128x32xf32>
    %58 = arith.truncf %57 : vector<128x32xf32> to vector<128x32xbf16>
    %c0_39 = arith.constant 0 : index
    %c256 = arith.constant 256 : index
    %59 = vector.load %arg10[%c0_39, %c256] : memref<128x288xbf16, #tpu.memory_space<vmem>>, vector<128x32xbf16>
    tpu.vector_store %arg10[%c0_39, %c256], %58 {strides = array<i32>} : memref<128x288xbf16, #tpu.memory_space<vmem>>, vector<128x32xbf16>,
    %c0_40 = arith.constant 0 : index
    %c0_41 = arith.constant 0 : index
    %60 = vector.load %arg10[%c0_40, %c0_41] : memref<128x288xbf16, #tpu.memory_space<vmem>>, vector<128x288xbf16>
    %c0_42 = arith.constant 0 : index
    %c0_43 = arith.constant 0 : index
    %61 = vector.load %arg4[%c0_42, %c0_43] : memref<288x64xbf16, #tpu.memory_space<vmem>>, vector<288x64xbf16>
    %cst_44 = arith.constant dense<0.000000e+00> : vector<128x64xf32>
    %62 = tpu.matmul %60, %61, %cst_44 {dimension_numbers = #tpu.dot_dimension_numbers<[1], [0], [0], [1], [0, 0, 1, 1], [], []>} : vector<128x288xbf16>, vector<288x64xbf16>, vector<128x64xf32> -> vector<128x64xf32>
    %c0_45 = arith.constant 0 : index
    %c0_46 = arith.constant 0 : index
    %63 = vector.load %arg5[%c0_45, %c0_46] : memref<1x64xf32, #tpu.memory_space<vmem>>, vector<1x64xf32>
    %64 = vector.broadcast %63 : vector<1x64xf32> to vector<128x64xf32>
    %65 = arith.addf %62, %64 : vector<128x64xf32>
    %cst_47 = arith.constant 0.000000e+00 : f32
    %66 = vector.broadcast %cst_47 : f32 to vector<128x64xf32>
    %67 = arith.maximumf %65, %66 : vector<128x64xf32>
    %68 = vector.extract_strided_slice %67 {offsets = [0, 0], sizes = [120, 64], strides = [1, 1]} : vector<128x64xf32> to vector<120x64xf32>
    %69 = vector.extract_strided_slice %67 {offsets = [1, 0], sizes = [120, 64], strides = [1, 1]} : vector<128x64xf32> to vector<120x64xf32>
    %70 = arith.maximumf %68, %69 : vector<120x64xf32>
    %71 = vector.extract_strided_slice %70 {offsets = [0, 0], sizes = [104, 64], strides = [1, 1]} : vector<120x64xf32> to vector<104x64xf32>
    %72 = vector.extract_strided_slice %70 {offsets = [16, 0], sizes = [104, 64], strides = [1, 1]} : vector<120x64xf32> to vector<104x64xf32>
    %73 = arith.maximumf %71, %72 : vector<104x64xf32>
    %c0_48 = arith.constant 0 : index
    %c0_49 = arith.constant 0 : index
    %74 = vector.load %arg6[%c0_48, %c0_49] : memref<104x64xf32, #tpu.memory_space<vmem>>, vector<104x64xf32>
    %75 = arith.mulf %73, %74 : vector<104x64xf32>
    %cst_50 = arith.constant dense<0.000000e+00> : vector<64xf32>
    %76 = vector.multi_reduction <add>, %75, %cst_50 [0] : vector<104x64xf32> to vector<64xf32>
    %77 = vector.shape_cast %76 : vector<64xf32> to vector<1x64xf32>
    %cst_51 = arith.constant dense<0.000000e+00> : vector<1xf32>
    %78 = vector.multi_reduction <add>, %77, %cst_51 [1] : vector<1x64xf32> to vector<1xf32>
    %79 = vector.shape_cast %78 : vector<1xf32> to vector<1x1xf32>
    %c0_52 = arith.constant 0 : index
    %c0_53 = arith.constant 0 : index
    %80 = vector.load %arg7[%c0_52, %c0_53] : memref<1x1xf32, #tpu.memory_space<vmem>>, vector<1x1xf32>
    %81 = arith.addf %79, %80 : vector<1x1xf32>
    %82 = vector.shape_cast %81 : vector<1x1xf32> to vector<1x1x1xf32>
    %83 = vector.shape_cast %82 : vector<1x1x1xf32> to vector<1x1x1xf32>
    %84 = vector.broadcast %83 : vector<1x1x1xf32> to vector<1x8x128xf32>
    %c0_54 = arith.constant 0 : index
    %c0_55 = arith.constant 0 : index
    %c0_56 = arith.constant 0 : index
    %85 = vector.load %arg8[%c0_54, %c0_55, %c0_56] : memref<1x8x128xf32, #tpu.memory_space<vmem>>, vector<1x8x128xf32>
    tpu.vector_store %arg8[%c0_54, %c0_55, %c0_56], %84 {strides = array<i32>} : memref<1x8x128xf32, #tpu.memory_space<vmem>>, vector<1x8x128xf32>,
    return
  }
  func.func @transform_0(%arg0: i32) -> (i32, i32) {
    %c0_i32 = arith.constant 0 : i32
    %c0_i32_0 = arith.constant 0 : i32
    return %arg0, %c0_i32 : i32, i32
  }
  func.func @transform_1(%arg0: i32) -> (i32, i32) {
    %c0_i32 = arith.constant 0 : i32
    %c0_i32_0 = arith.constant 0 : i32
    %c0_i32_1 = arith.constant 0 : i32
    return %c0_i32, %c0_i32_0 : i32, i32
  }
  func.func @transform_2(%arg0: i32) -> (i32, i32) {
    %c0_i32 = arith.constant 0 : i32
    %c0_i32_0 = arith.constant 0 : i32
    %c0_i32_1 = arith.constant 0 : i32
    return %c0_i32, %c0_i32_0 : i32, i32
  }
  func.func @transform_3(%arg0: i32) -> (i32, i32) {
    %c0_i32 = arith.constant 0 : i32
    %c0_i32_0 = arith.constant 0 : i32
    %c0_i32_1 = arith.constant 0 : i32
    return %c0_i32, %c0_i32_0 : i32, i32
  }
  func.func @transform_4(%arg0: i32) -> (i32, i32) {
    %c0_i32 = arith.constant 0 : i32
    %c0_i32_0 = arith.constant 0 : i32
    %c0_i32_1 = arith.constant 0 : i32
    return %c0_i32, %c0_i32_0 : i32, i32
  }
  func.func @transform_5(%arg0: i32) -> (i32, i32) {
    %c0_i32 = arith.constant 0 : i32
    %c0_i32_0 = arith.constant 0 : i32
    %c0_i32_1 = arith.constant 0 : i32
    return %c0_i32, %c0_i32_0 : i32, i32
  }
  func.func @transform_6(%arg0: i32) -> (i32, i32) {
    %c0_i32 = arith.constant 0 : i32
    %c0_i32_0 = arith.constant 0 : i32
    %c0_i32_1 = arith.constant 0 : i32
    return %c0_i32, %c0_i32_0 : i32, i32
  }
  func.func @transform_7(%arg0: i32) -> (i32, i32, i32) {
    %c0_i32 = arith.constant 0 : i32
    %c0_i32_0 = arith.constant 0 : i32
    %c0_i32_1 = arith.constant 0 : i32
    return %arg0, %c0_i32, %c0_i32_0 : i32, i32, i32
  }
}

</mosaic_0001>

<bundles_post_ra>
// kernel: forward_pallas.1
= control target key start
LH: loop header
LB: loop body
LE: loop exit
PB: predicated region body
PF: predicated region fallthrough
CT: control target
= control target key end

     0   :  { %s3193_s26 = smov 0   ;;  %s4009_s0 = inlined_call_operand.vmem [shape: bf16[512,32], index: 0, kind: input, shape index: {}]   ;;  %s4010_s1 = inlined_call_operand.vmem [shape: bf16[32,32], index: 1, kind: input, shape index: {}]   ;;  %s4011_s2 = inlined_call_operand.vmem [shape: f32[1,32], index: 2, kind: input, shape index: {}]   ;;  %s4012_s3 = inlined_call_operand.vmem [shape: bf16[288,64], index: 3, kind: input, shape index: {}]   ;;  %s4013_s4 = inlined_call_operand.vmem [shape: f32[1,64], index: 4, kind: input, shape index: {}]   ;;  %s4014_s5 = inlined_call_operand.vmem [shape: f32[104,64], index: 5, kind: input, shape index: {}]   ;;  %s4015_s6 = inlined_call_operand.<no memory space> [shape: f32[1,1], index: 6, kind: input, shape index: {}]   ;;  %s4016_s7 = inlined_call_operand.vmem [shape: f32[2,8,128], index: 7, kind: output, shape index: {}]  }
   0x1   :  { %v12_v0 = vstv %s4015_s6 }
   0x2   :  { %13 = vst [vmem:[#allocation4] sm:$0x1] %v12_v0 }
   0x3 LB: > { %s3199_s27 = sadd.s32 4294967295, %s3143_s26   ;;  %p2530_p0 = scmp.ge.s32.totalorder %s3143_s26, 1  ;;  %s3143_s26 = sphi %s3193_s26, %s19_s26  }
   0x4   : > { %p240_p1 = scmp.lt.s32.totalorder %s3143_s26, 3 }
   0x6   : > { %p241_p2 = pnand %p2530_p0, %p240_p1 }
   0x7   : > { %s2531_s6 = sshll.u32 (!%p241_p2), %s3199_s27, 5  ;;  %s3146_s13 = smov (!%p241_p2), 96  }
   0x8   : > { %244 = sbr.rel (%p241_p2) target bundleno = 1081 (0x439), region = 48  ;;  %p272_p3 = scmp.lt.s32.totalorder (!%p241_p2), %s2531_s6, 63 }
   0x9   : > { %s3147_s14 = smov (!%p241_p2), 32   ;;  %s3148_s15 = smov (!%p241_p2), 64  }
   0xa   : > { %p277_p4 = scmp.lt.s32.totalorder (!%p241_p2), %s3199_s27, 1 }
   0xd   : > { %v3073_v1 = vld [vmem:[%s4010_s1 + $0x8] sm:$0xff]   ;;  %v3074_v2 = vld [vmem:[%s4010_s1] sm:$0xff]   ;;  %s4018_s6 = smov (!%p272_p3, %s2531_s6), 63  ;;  %vm282_vm0 = vcmask 261120   ;;  %v3145_v19 = vmov 0.0   ;;  %vm792_vm1 = vcmask 257024  }
   0xe   : > { %3002 = vmatprep.subr.bf16.mxu0 %v3073_v1  ;;  %s2532_s9 = sshll.u32 %s4018_s6, 2  ;;  %288 = vst.msk [vmem:[#allocation2 + $0x28] sm:$0xff] %vm282_vm0, %v3145_v19  ;;  %289 = vst.msk [vmem:[#allocation2 + $0x30] sm:$0xff] %vm282_vm0, %v3145_v19  ;;  %v3091_v42 = vld [vmem:[%s4012_s3 + $0x88] sm:$0xff]   ;;  %v3092_v43 = vld [vmem:[%s4012_s3 + $0x80] sm:$0xff]   ;;  %vm921_vm2 = vcmask 519424  }
   0xf   : > { %3003 = vmatpush3.bf16.msra.mxu0 %v3073_v1  ;;  %s3213_s12 = scalar_lea.vmem %s4009_s0, %s2532_s9  ;;  %283 = vst.msk [vmem:[#allocation2] sm:$0xff] %vm282_vm0, %v3145_v19  ;;  %284 = vst.msk [vmem:[#allocation2 + $0x8] sm:$0xff] %vm282_vm0, %v3145_v19  ;;  %vm1050_vm3 = vcmask 781824   ;;  %vm1179_vm4 = vcmask 1044224   ;;  %vm2325_vm5 = vcmask 1046528   ;;  %vm2426_vm6 = vcmask 523264  }
  0x10   : > { %3004 = vmatprep.subr.bf16.mxu0 %v3074_v2  ;;  %v3075_v3 = vld [vmem:[%s3213_s12] sm:$0xff]   ;;  %v3076_v4 = vld [vmem:[%s3213_s12 + $0x8] sm:$0xff]   ;;  %v3077_v5 = vld [vmem:[%s3213_s12 + $0x10] sm:$0xff]   ;;  %285 = vst.msk [vmem:[#allocation2 + $0x10] sm:$0xff] %vm282_vm0, %v3145_v19  ;;  %s4020_s27 = smov (!%p277_p4, %s3199_s27), 1 }
  0x11   : > { %3006 = vmatprep.mubr.msk.bf16.mxu0 %vm282_vm0, %v3075_v3  ;;  %v3078_v6 = vld [vmem:[%s3213_s12 + $0x18] sm:$0xff]   ;;  %v3079_v7 = vld [vmem:[%s3213_s12 + $0x20] sm:$0xff]   ;;  %v3080_v8 = vld [vmem:[%s3213_s12 + $0x28] sm:$0xff]   ;;  %286 = vst.msk [vmem:[#allocation2 + $0x18] sm:$0xff] %vm282_vm0, %v3145_v19  ;;  %s2533_s19 = sshll.u32 %s4020_s27, 3 }
  0x12   : > { %v3081_v9 = vld [vmem:[%s3213_s12 + $0x30] sm:$0xff]   ;;  %v3082_v10 = vld [vmem:[%s3213_s12 + $0x38] sm:$0xff]   ;;  %v3083_v11 = vld [vmem:[%s3213_s12 + $0x40] sm:$0xff]   ;;  %287 = vst.msk [vmem:[#allocation2 + $0x20] sm:$0xff] %vm282_vm0, %v3145_v19  ;;  %s280_s22 = scalar_lea.vmem %s4016_s7, %s2533_s19 }
  0x13   : > { %3005 = vmatpush3.bf16.msra.mxu0 %v3074_v2  ;;  %v3084_v12 = vld [vmem:[%s3213_s12 + $0x48] sm:$0xff]   ;;  %v3085_v13 = vld [vmem:[%s3213_s12 + $0x50] sm:$0xff]   ;;  %v3086_v14 = vld [vmem:[%s3213_s12 + $0x58] sm:$0xff]   ;;  %290 = vst.msk [vmem:[#allocation2 + $0x38] sm:$0xff] %vm282_vm0, %v3145_v19 }
  0x14   : > { %v3087_v15 = vld [vmem:[%s3213_s12 + $0x60] sm:$0xff]   ;;  %v3088_v16 = vld [vmem:[%s3213_s12 + $0x68] sm:$0xff]   ;;  %v3089_v17 = vld [vmem:[%s3213_s12 + $0x70] sm:$0xff]   ;;  %291 = vst.msk [vmem:[#allocation2 + $0x40] sm:$0xff] %vm282_vm0, %v3145_v19  ;;  %3038 = vmatprep.subr.bf16.mxu0 %v3091_v42 }
  0x15   : > { %v3090_v18 = vld [vmem:[%s3213_s12 + $0x78] sm:$0xff]   ;;  %292 = vst.msk [vmem:[#allocation2 + $0x48] sm:$0xff] %vm282_vm0, %v3145_v19  ;;  %293 = vst.msk [vmem:[#allocation2 + $0x50] sm:$0xff] %vm282_vm0, %v3145_v19  ;;  %v1549_v20 = vld [vmem:[#allocation2 + $0x29] sm:$0xff] }
  0x16   : > { %3007 = vmatmul.mubr.msk.bf16.vlgmr.msra.gmra.mxu0 %vm282_vm0, %v3076_v4  ;;  %294 = vst.msk [vmem:[#allocation2 + $0x58] sm:$0xff] %vm282_vm0, %v3145_v19  ;;  %295 = vst.msk [vmem:[#allocation2 + $0x60] sm:$0xff] %vm282_vm0, %v3145_v19  ;;  %v2879_v21 = vpack.c.bf16 %v1549_v20, %v1549_v20  ;;  %v809_v34 = vld [vmem:[#allocation2 + $0x1] sm:$0xff] }
  0x17   : > { %3010 = vmatprep.mubr.msk.bf16.mxu0 %vm282_vm0, %v3077_v5  ;;  %296 = vst.msk [vmem:[#allocation2 + $0x68] sm:$0xff] %vm282_vm0, %v3145_v19  ;;  %297 = vst.msk [vmem:[#allocation2 + $0x70] sm:$0xff] %vm282_vm0, %v3145_v19  ;;  %v2782_v35 = vpack.c.bf16 %v809_v34, %v809_v34  ;;  %v810_v37 = vld [vmem:[#allocation2 + $0x9] sm:$0xff]  ;;  %3039 = vmatpush3.bf16.msra.mxu0 %v3091_v42 }
  0x18   : > { %298 = vst.msk [vmem:[#allocation2 + $0x78] sm:$0xff] %vm282_vm0, %v3145_v19  ;;  %299 = vst.msk [vmem:[#allocation2 + $0x80] sm:$0xff] %vm282_vm0, %v3145_v19  ;;  %1614 = vrot.lane.b32.xlu1 %v2879_v21, %s3146_s13  ;;  %v2783_v39 = vpack.c.bf16 %v810_v37, %v810_v37  ;;  %v938_v40 = vld [vmem:[#allocation2 + $0x2] sm:$0xff]  ;;  %3040 = vmatprep.subr.bf16.mxu0 %v3092_v43 }
  0x19   : > { %300 = vst.msk [vmem:[#allocation2 + $0x88] sm:$0xff] %vm282_vm0, %v3145_v19  ;;  %301 = vst.msk [vmem:[#allocation2 + $0x90] sm:$0xff] %vm282_vm0, %v3145_v19  ;;  %v812_v22 = vld [vmem:[#allocation2 + $0x19] sm:$0xff]  ;;  %873 = vrot.lane.b32.xlu0 %v2782_v35, %s3147_s14  ;;  %v2798_v41 = vpack.c.bf16 %v938_v40, %v938_v40 }
  0x1a   : > { %302 = vst.msk [vmem:[#allocation2 + $0x98] sm:$0xff] %vm282_vm0, %v3145_v19  ;;  %303 = vst.msk [vmem:[#allocation2 + $0xa0] sm:$0xff] %vm282_vm0, %v3145_v19  ;;  %v2785_v23 = vpack.c.bf16 %v812_v22, %v812_v22 }
  0x1b   : > { %v1551_v24 = vld [vmem:[#allocation2 + $0x39] sm:$0xff]  ;;  %1279 = vst.msk [vmem:[#allocation3 + $0x28] sm:$0xf] %vm792_vm1, %v2879_v21  ;;  %3041 = vmatpush3.bf16.msra.mxu0 %v3092_v43 }
  0x1c   : > { %879 = vrot.lane.b32.xlu1 %v2785_v23, %s3147_s14  ;;  %v2881_v25 = vpack.c.bf16 %v1551_v24, %v1551_v24  ;;  %v1553_v26 = vld [vmem:[#allocation2 + $0x49] sm:$0xff] }
  0x1d   : > { %v2883_v27 = vpack.c.bf16 %v1553_v26, %v1553_v26  ;;  %v1555_v28 = vld [vmem:[#allocation2 + $0x59] sm:$0xff]  ;;  %875 = vrot.lane.b32.xlu0 %v2783_v39, %s3147_s14  ;;  %v713_v24 = vld [vmem:[#allocation2 + $0x8] sm:$0xff] }
  0x1e   : > { %3011 = vmatmul.mubr.msk.bf16.gmra.mxu0 %vm282_vm0, %v3078_v6  ;;  %v2885_v29 = vpack.c.bf16 %v1555_v28, %v1555_v28  ;;  %v1557_v30 = vld [vmem:[#allocation2 + $0x69] sm:$0xff]  ;;  %v2767_v28 = vpack.c.bf16 %v713_v24, %v713_v24 }
  0x1f   : > { %3014 = vmatprep.mubr.msk.bf16.mxu0 %vm282_vm0, %v3079_v7  ;;  %v2887_v31 = vpack.c.bf16 %v1557_v30, %v1557_v30  ;;  %v1559_v32 = vld [vmem:[#allocation2 + $0x79] sm:$0xff] }
  0x20   : > { %1618 = vrot.lane.b32.xlu1 %v2881_v25, %s3146_s13  ;;  %v2889_v33 = vpack.c.bf16 %v1559_v32, %v1559_v32  ;;  %v1561_v36 = vld [vmem:[#allocation2 + $0x89] sm:$0xff]  ;;  %794 = vst.msk [vmem:[#allocation3 + $0xc] sm:$0xf] %vm792_vm1, %v2767_v28 }
  0x21   : > { %v2891_v38 = vpack.c.bf16 %v1561_v36, %v1561_v36  ;;  %1002 = vrot.lane.b32.xlu0 %v2798_v41, %s3148_s15  ;;  %v1689_v44 = vld [vmem:[#allocation2 + $0x8a] sm:$0xff] }
  0x22   : > { %v3292_v45 = vpack.c.bf16 %v1689_v44, %v1689_v44 }
  0x24   : > { %883 = vrot.lane.b32.xlu1 %v2879_v21, %s3147_s14  ;;  %1769 = vst.msk [vmem:[#allocation3 + $0xa4] sm:$0xf] %vm792_vm1, %v3292_v45 }
  0x26   : > { %3015 = vmatmul.mubr.msk.bf16.gmra.mxu0 %vm282_vm0, %v3080_v8 }
  0x27   : > { %3018 = vmatprep.mubr.msk.bf16.mxu0 %vm282_vm0, %v3081_v9  ;;  %v3321_v9 = vld [vmem:[%s4011_s2] ss:$0 sm:$0xff] }
  0x28   : > { %1622 = vrot.lane.b32.xlu1 %v2883_v27, %s3146_s13 }
  0x2c   : > { %887 = vrot.lane.b32.xlu1 %v2881_v25, %s3147_s14 }
  0x2e   : > { %3019 = vmatmul.mubr.msk.bf16.gmra.mxu0 %vm282_vm0, %v3082_v10 }
  0x2f   : > { %3022 = vmatprep.mubr.msk.bf16.mxu0 %vm282_vm0, %v3083_v11 }
  0x30   : > { %1626 = vrot.lane.b32.xlu1 %v2885_v29, %s3146_s13 }
  0x34   : > { %891 = vrot.lane.b32.xlu1 %v2883_v27, %s3147_s14 }
  0x36   : > { %3023 = vmatmul.mubr.msk.bf16.gmra.mxu0 %vm282_vm0, %v3084_v12  ;;  %v712_v12 = vld [vmem:[#allocation2] sm:$0xff] }
  0x37   : > { %3026 = vmatprep.mubr.msk.bf16.mxu0 %vm282_vm0, %v3085_v13 }
  0x38   : > { %1630 = vrot.lane.b32.xlu1 %v2887_v31, %s3146_s13 }
  0x3c   : > { %895 = vrot.lane.b32.xlu1 %v2885_v29, %s3147_s14 }
  0x3e   : > { %3027 = vmatmul.mubr.msk.bf16.gmra.mxu0 %vm282_vm0, %v3086_v14  ;;  %v2766_v14 = vpack.c.bf16 %v712_v12, %v712_v12 }
  0x3f   : > { %3030 = vmatprep.mubr.msk.bf16.mxu0 %vm282_vm0, %v3087_v15 }
  0x40   : > { %1634 = vrot.lane.b32.xlu1 %v2889_v33, %s3146_s13  ;;  %793 = vst.msk [vmem:[#allocation3] sm:$0xf] %vm792_vm1, %v2766_v14 }
  0x44   : > { %899 = vrot.lane.b32.xlu1 %v2887_v31, %s3147_s14 }
  0x46   : > { %3031 = vmatmul.mubr.msk.bf16.gmra.mxu0 %vm282_vm0, %v3088_v16 }
  0x47   : > { %3034 = vmatprep.mubr.msk.bf16.mxu0 %vm282_vm0, %v3089_v17 }
  0x48   : > { %1638 = vrot.lane.b32.xlu1 %v2891_v38, %s3146_s13 }
  0x4c   : > { %903 = vrot.lane.b32.xlu1 %v2889_v33, %s3147_s14 }
  0x4e   : > { %3035 = vmatmul.mubr.msk.bf16.gmra.mxu0 %vm282_vm0, %v3090_v18 }
  0x8a   : > { %v3296_v46 = vpop.permute.xlu1 %1614 }
  0x8b   : > { %v874_v13 = vpop.permute.xlu0 %873 }
  0x8c   : > { %922 = vst.msk [vmem:[#allocation3] sm:$0xf] %vm921_vm2, %v874_v13 }
  0x8e   : > { %v3298_v49 = vpop.permute.xlu1 %879 }
  0x8f   : > { %v876_v29 = vpop.permute.xlu0 %875 }
  0x90   : > { %923 = vst.msk [vmem:[#allocation3 + $0xc] sm:$0xf] %vm921_vm2, %v876_v29 }
  0x92   : > { %v3300_v53 = vpop.permute.xlu1 %1618 }
  0x96   : > { %v3302_v57 = vpop.permute.xlu1 %883 }
  0x9a   : > { %v3304_v61 = vpop.permute.xlu1 %1622 }
  0x9e   : > { %v3310_v1 = vpop.permute.xlu1 %887 }
  0xa2   : > { %v3316_v5 = vpop.permute.xlu1 %1626 }
  0xa6   : > { %v3323_v10 = vpop.permute.xlu1 %891 }
  0xaa   : > { %v3346_v27 = vpop.permute.xlu1 %1630 }
  0xd6   : > { %v3008_v47 = vpop.f32.mrf.mxu0 }
  0xd7   : > { %v530_v15 = vadd.f32 %v3008_v47, %v3321_v9  ;;  %v1003_v47 = vpop.permute.xlu0 %1002 }
  0xd8   : > { %v521_v48 = vpop.f32.mrf.mxu0  ;;  %1051 = vst.msk [vmem:[#allocation3] sm:$0xf] %vm1050_vm3, %v1003_v47 }
  0xd9   : > { %v522_v17 = vadd.f32 %v3321_v9, %v521_v48  ;;  %v650_v30 = vmax.f32 %v530_v15, 0.0 }
  0xda   : > { %v3009_v50 = vpop.f32.mrf.mxu0 }
  0xdb   : > { %v533_v18 = vadd.f32 %v3009_v50, %v3321_v9  ;;  %v648_v33 = vmax.f32 %v522_v17, 0.0 }
  0xdc   : > { %v524_v51 = vpop.f32.mrf.mxu0 }
  0xdd   : > { %v525_v20 = vadd.f32 %v3321_v9, %v524_v51  ;;  %v651_v34 = vmax.f32 %v533_v18, 0.0 }
  0xde   : > { %v3012_v52 = vpop.f32.mrf.mxu0 }
  0xdf   : > { %v3341_v25 = vadd.f32 %v3012_v52, %v3321_v9  ;;  %v649_v37 = vmax.f32 %v525_v20, 0.0 }
  0xe0   : > { %v537_v54 = vpop.f32.mrf.mxu0 }
  0xe1   : > { %v3344_v26 = vadd.f32 %v3321_v9, %v537_v54  ;;  %v654_v41 = vmax.f32 %v3341_v25, 0.0 }
  0xe2   : > { %v3013_v55 = vpop.f32.mrf.mxu0 }
  0xe3   : > { %v652_v42 = vmax.f32 %v3344_v26, 0.0  ;;  %v3359_v48 = vadd.f32 %v3013_v55, %v3321_v9 }
  0xe4   : > { %v540_v56 = vpop.f32.mrf.mxu0 }
  0xe5   : > { %v3362_v50 = vadd.f32 %v3321_v9, %v540_v56 }
  0xe6   : > { %v3016_v58 = vpop.f32.mrf.mxu0 }
  0xe7   : > { %v562_v19 = vadd.f32 %v3016_v58, %v3321_v9 }
  0xe8   : > { %v553_v59 = vpop.f32.mrf.mxu0 }
  0xe9   : > { %v554_v21 = vadd.f32 %v3321_v9, %v553_v59  ;;  %v658_v35 = vmax.f32 %v562_v19, 0.0 }
  0xea   : > { %v3017_v60 = vpop.f32.mrf.mxu0 }
  0xeb   : > { %v565_v22 = vadd.f32 %v3017_v60, %v3321_v9  ;;  %v656_v38 = vmax.f32 %v554_v21, 0.0  ;;  %v682_v58 = vmax.f32 %v650_v30, %v658_v35 }
  0xec   : > { %v556_v62 = vpop.f32.mrf.mxu0 }
  0xed   : > { %v557_v31 = vadd.f32 %v3321_v9, %v556_v62  ;;  %v659_v39 = vmax.f32 %v565_v22, 0.0 }
  0xee   : > { %v3306_v63 = vpop.f32.mrf.mxu0 }
  0xef   : > { %v657_v51 = vmax.f32 %v557_v31, 0.0  ;;  %v683_v12 = vmax.f32 %v651_v34, %v659_v39  ;;  %v578_v55 = vadd.f32 %v3306_v63, %v3321_v9 }
  0xf0   : > { %v3308_v0 = vpop.f32.mrf.mxu0 }
  0xf1   : > { %v681_v18 = vmax.f32 %v649_v37, %v657_v51  ;;  %v570_v19 = vadd.f32 %v3321_v9, %v3308_v0  ;;  %v662_v28 = vmax.f32 %v578_v55, 0.0 }
  0xf2   : > { %v3312_v2 = vpop.f32.mrf.mxu0 }
  0xf3   : > { %v581_v29 = vadd.f32 %v3312_v2, %v3321_v9  ;;  %v660_v37 = vmax.f32 %v570_v19, 0.0  ;;  %v686_v51 = vmax.f32 %v654_v41, %v662_v28 }
  0xf4   : > { %v3314_v3 = vpop.f32.mrf.mxu0 }
  0xf6   : > { %v3024_v4 = vpop.f32.mrf.mxu0 }
  0xf7   : > { %v594_v36 = vadd.f32 %v3024_v4, %v3321_v9  ;;  %v3367_v4 = vpop.permute.xlu1 %895 }
  0xf8   : > { %v585_v6 = vpop.f32.mrf.mxu0 }
  0xf9   : > { %v586_v43 = vadd.f32 %v3321_v9, %v585_v6  ;;  %v666_v59 = vmax.f32 %v594_v36, 0.0  ;;  %v680_v6 = vmax.f32 %v648_v33, %v656_v38  ;;  %v573_v38 = vadd.f32 %v3321_v9, %v3314_v3 }
  0xfa   : > { %v3025_v7 = vpop.f32.mrf.mxu0 }
  0xfb   : > { %v597_v52 = vadd.f32 %v3025_v7, %v3321_v9  ;;  %v664_v14 = vmax.f32 %v586_v43, 0.0  ;;  %v3384_v36 = vpop.permute.xlu1 %1634  ;;  %v661_v55 = vmax.f32 %v573_v38, 0.0 }
  0xfc   : > { %v588_v8 = vpop.f32.mrf.mxu0 }
  0xfd   : > { %v589_v56 = vadd.f32 %v3321_v9, %v588_v8  ;;  %v667_v20 = vmax.f32 %v597_v52, 0.0  ;;  %v663_v52 = vmax.f32 %v581_v29, 0.0 }
  0xfe   : > { %v3325_v11 = vpop.f32.mrf.mxu0 }
  0xff   : > { %v610_v21 = vadd.f32 %v3325_v11, %v3321_v9  ;;  %v665_v30 = vmax.f32 %v589_v56, 0.0 }
 0x100   : > { %v3328_v16 = vpop.f32.mrf.mxu0 }
 0x101   : > { %v602_v31 = vadd.f32 %v3321_v9, %v3328_v16  ;;  %v670_v39 = vmax.f32 %v610_v21, 0.0 }
 0x102   : > { %v3337_v23 = vpop.f32.mrf.mxu0 }
 0x103   : > { %v613_v2 = vadd.f32 %v3337_v23, %v3321_v9 }
 0x104   : > { %v3349_v32 = vpop.f32.mrf.mxu0 }
 0x105   : > { %v671_v41 = vmax.f32 %v613_v2, 0.0 }
 0x106   : > { %v3032_v40 = vpop.f32.mrf.mxu0 }
 0x107   : > { %v626_v44 = vadd.f32 %v3032_v40, %v3321_v9 }
 0x108   : > { %v617_v54 = vpop.f32.mrf.mxu0 }
 0x109   : > { %v674_v60 = vmax.f32 %v626_v44, 0.0  ;;  %v618_v62 = vadd.f32 %v3321_v9, %v617_v54  ;;  %v668_v54 = vmax.f32 %v602_v31, 0.0 }
 0x10a   : > { %v3033_v13 = vpop.f32.mrf.mxu0 }
 0x10b   : > { %v690_v7 = vmax.f32 %v666_v59, %v674_v60  ;;  %v672_v15 = vmax.f32 %v618_v62, 0.0  ;;  %v629_v17 = vadd.f32 %v3033_v13, %v3321_v9 }
 0x10c   : > { %v620_v22 = vpop.f32.mrf.mxu0 }
 0x10d   : > { %v698_v24 = vmax.f32 %v682_v58, %v690_v7  ;;  %v688_v25 = vmax.f32 %v664_v14, %v672_v15  ;;  %v675_v63 = vmax.f32 %v629_v17, 0.0  ;;  %v621_v8 = vadd.f32 %v3321_v9, %v620_v22  ;;  %v3401_v15 = vpop.permute.xlu1 %899 }
 0x10e   : > { %v3036_v33 = vpop.f32.mrf.mxu0  ;;  %v605_v58 = vadd.f32 %v3321_v9, %v3349_v32  ;;  %v653_v17 = vmax.f32 %v3362_v50, 0.0 }
 0x10f   : > { %706 = vst.msk [vmem:[#allocation2 + $0x31] sm:$0xff] %vm282_vm0, %v698_v24  ;;  %v696_v0 = vmax.f32 %v680_v6, %v688_v25  ;;  %v691_v34 = vmax.f32 %v667_v20, %v675_v63  ;;  %v673_v11 = vmax.f32 %v621_v8, 0.0  ;;  %v642_v35 = vadd.f32 %v3036_v33, %v3321_v9 }
 0x110   : > { %v633_v40 = vpop.f32.mrf.mxu0  ;;  %v655_v6 = vmax.f32 %v3359_v48, 0.0  ;;  %v669_v19 = vmax.f32 %v605_v58, 0.0 }
 0x111   : > { %704 = vst.msk [vmem:[#allocation2 + $0x11] sm:$0xff] %vm282_vm0, %v696_v0  ;;  %v699_v16 = vmax.f32 %v683_v12, %v691_v34  ;;  %v689_v43 = vmax.f32 %v665_v30, %v673_v11  ;;  %v678_v44 = vmax.f32 %v642_v35, 0.0  ;;  %v634_v47 = vadd.f32 %v3321_v9, %v633_v40 }
 0x112   : > { %v3037_v59 = vpop.f32.mrf.mxu0  ;;  %v684_v12 = vmax.f32 %v652_v42, %v660_v37  ;;  %v685_v30 = vmax.f32 %v653_v17, %v661_v55 }
 0x113   : > { %707 = vst.msk [vmem:[#allocation2 + $0x41] sm:$0xff] %vm282_vm0, %v699_v16  ;;  %v697_v3 = vmax.f32 %v681_v18, %v689_v43  ;;  %v694_v60 = vmax.f32 %v670_v39, %v678_v44  ;;  %v676_v23 = vmax.f32 %v634_v47, 0.0  ;;  %v645_v62 = vadd.f32 %v3037_v59, %v3321_v9 }
 0x114   : > { %v636_v56 = vpop.f32.mrf.mxu0  ;;  %v687_v18 = vmax.f32 %v655_v6, %v663_v52  ;;  %v3445_v52 = vpop.permute.xlu1 %1638 }
 0x115   : > { %705 = vst.msk [vmem:[#allocation2 + $0x21] sm:$0xff] %vm282_vm0, %v697_v3  ;;  %v702_v13 = vmax.f32 %v686_v51, %v694_v60  ;;  %v692_v32 = vmax.f32 %v668_v54, %v676_v23  ;;  %v679_v14 = vmax.f32 %v645_v62, 0.0  ;;  %v637_v7 = vadd.f32 %v3321_v9, %v636_v56 }
 0x116   : > { %v1678_v48 = vld [vmem:[#allocation2 + $0x32] sm:$0xff]  ;;  %v1295_v26 = vld [vmem:[#allocation2 + $0x2a] sm:$0xff] }
 0x117   : > { %v1422_v20 = vld [vmem:[#allocation2 + $0x30] sm:$0xff]  ;;  %v3404_v42 = vpack.c.bf16 %v1678_v48, %v1678_v48  ;;  %710 = vst.msk [vmem:[#allocation2 + $0x71] sm:$0xff] %vm282_vm0, %v702_v13  ;;  %v700_v21 = vmax.f32 %v684_v12, %v692_v32  ;;  %v695_v22 = vmax.f32 %v671_v41, %v679_v14  ;;  %v677_v24 = vmax.f32 %v637_v7, 0.0  ;;  %v1423_v63 = vld [vmem:[#allocation2 + $0x38] sm:$0xff] }
 0x118   : > { %v1550_v25 = vld [vmem:[#allocation2 + $0x31] sm:$0xff]  ;;  %v3407_v8 = vpack.c.bf16 %v1422_v20, %v1422_v20  ;;  %v3409_v9 = vpack.c.bf16 %v1295_v26, %v1295_v26  ;;  %v3413_v50 = vpack.c.bf16 %v1423_v63, %v1423_v63 }
 0x119   : > { %v3411_v28 = vpack.c.bf16 %v1550_v25, %v1550_v25  ;;  %v1067_v29 = vld [vmem:[#allocation2 + $0x10] sm:$0xff]  ;;  %1758 = vst.msk [vmem:[#allocation3 + $0x20] sm:$0xf] %vm792_vm1, %v3404_v42  ;;  %v703_v31 = vmax.f32 %v687_v18, %v695_v22  ;;  %v693_v33 = vmax.f32 %v669_v19, %v677_v24  ;;  %v1068_v0 = vld [vmem:[#allocation2 + $0x18] sm:$0xff] }
 0x11a   : > { %708 = vst.msk [vmem:[#allocation2 + $0x51] sm:$0xff] %vm282_vm0, %v700_v21  ;;  %v811_v34 = vld [vmem:[#allocation2 + $0x11] sm:$0xff]  ;;  %v1679_v11 = vld [vmem:[#allocation2 + $0x3a] sm:$0xff]  ;;  %1488 = vrot.lane.b32.xlu0 %v3407_v8, %s3148_s15  ;;  %1362 = vrot.lane.b32.xlu1 %v3409_v9, %s3147_s14  ;;  %v1680_v35 = vld [vmem:[#allocation2 + $0x42] sm:$0xff]  ;;  %v3424_v37 = vpack.c.bf16 %v1067_v29, %v1067_v29  ;;  %v3426_v38 = vpack.c.bf16 %v1068_v0, %v1068_v0  ;;  %v904_v21 = vpop.permute.xlu1 %903 }
 0x11b   : > { %1757 = vst.msk [vmem:[#allocation3 + $0x14] sm:$0xf] %vm792_vm1, %v3409_v9  ;;  %v3428_v39 = vpack.c.bf16 %v811_v34, %v811_v34  ;;  %v1425_v2 = vld [vmem:[#allocation2 + $0x48] sm:$0xff]  ;;  %800 = vst.msk [vmem:[#allocation3 + $0x54] sm:$0xf] %vm792_vm1, %v3413_v50  ;;  %v3436_v40 = vpack.c.bf16 %v1679_v11, %v1679_v11  ;;  %v701_v16 = vmax.f32 %v685_v30, %v693_v33  ;;  %v1424_v47 = vld [vmem:[#allocation2 + $0x40] sm:$0xff] }
 0x11c   : > { %1280 = vst.msk [vmem:[#allocation3 + $0x34] sm:$0xf] %vm792_vm1, %v3411_v28  ;;  %799 = vst.msk [vmem:[#allocation3 + $0x48] sm:$0xf] %vm792_vm1, %v3407_v8  ;;  %v3439_v43 = vpack.c.bf16 %v1680_v35, %v1680_v35  ;;  %v3441_v44 = vpack.c.bf16 %v1425_v2, %v1425_v2  ;;  %v1552_v51 = vld [vmem:[#allocation2 + $0x41] sm:$0xff]  ;;  %v3447_v58 = vpack.c.bf16 %v1424_v47, %v1424_v47  ;;  %v1292_v33 = vld [vmem:[#allocation2 + $0x12] sm:$0xff] }
 0x11d   : > { %711 = vst.msk [vmem:[#allocation2 + $0x81] sm:$0xff] %vm282_vm0, %v703_v31  ;;  %v1676_v54 = vld [vmem:[#allocation2 + $0x22] sm:$0xff]  ;;  %v3449_v59 = vpack.c.bf16 %v1552_v51, %v1552_v51  ;;  %709 = vst.msk [vmem:[#allocation2 + $0x61] sm:$0xff] %vm282_vm0, %v701_v16 }
 0x11e   : > { %929 = vst.msk [vmem:[#allocation3 + $0x54] sm:$0xf] %vm921_vm2, %v3310_v1  ;;  %v1421_v3 = vld [vmem:[#allocation2 + $0x28] sm:$0xff]  ;;  %v3460_v1 = vpack.c.bf16 %v1676_v54, %v1676_v54  ;;  %v1420_v23 = vld [vmem:[#allocation2 + $0x20] sm:$0xff]  ;;  %1616 = vrot.lane.b32.xlu0 %v3411_v28, %s3146_s13  ;;  %1490 = vrot.lane.b32.xlu1 %v3413_v50, %s3148_s15  ;;  %v1686_v12 = vld [vmem:[#allocation2 + $0x72] sm:$0xff] }
 0x11f   : > { %796 = vst.msk [vmem:[#allocation3 + $0x24] sm:$0xf] %vm792_vm1, %v3426_v38  ;;  %1276 = vst.msk [vmem:[#allocation3 + $0x4] sm:$0xf] %vm792_vm1, %v3428_v39  ;;  %v3464_v60 = vpack.c.bf16 %v1421_v3, %v1421_v3  ;;  %v1548_v62 = vld [vmem:[#allocation2 + $0x21] sm:$0xff]  ;;  %v1685_v6 = vld [vmem:[#allocation2 + $0x6a] sm:$0xff]  ;;  %v3474_v55 = vpack.c.bf16 %v1420_v23, %v1420_v23  ;;  %v3488_v13 = vpack.c.bf16 %v1686_v12, %v1686_v12 }
 0x120   : > { %795 = vst.msk [vmem:[#allocation3 + $0x18] sm:$0xf] %vm792_vm1, %v3424_v37  ;;  %1759 = vst.msk [vmem:[#allocation3 + $0x2c] sm:$0xf] %vm792_vm1, %v3436_v40  ;;  %v1431_v41 = vld [vmem:[#allocation2 + $0x78] sm:$0xff]  ;;  %v3476_v56 = vpack.c.bf16 %v1548_v62, %v1548_v62  ;;  %v1430_v14 = vld [vmem:[#allocation2 + $0x70] sm:$0xff] }
 0x121   : > { %1760 = vst.msk [vmem:[#allocation3 + $0x38] sm:$0xf] %vm792_vm1, %v3439_v43  ;;  %802 = vst.msk [vmem:[#allocation3 + $0x6c] sm:$0xf] %vm792_vm1, %v3441_v44  ;;  %v3490_v32 = vpack.c.bf16 %v1431_v41, %v1431_v41  ;;  %v1681_v7 = vld [vmem:[#allocation2 + $0x4a] sm:$0xff]  ;;  %v1682_v17 = vld [vmem:[#allocation2 + $0x52] sm:$0xff]  ;;  %v3496_v18 = vpack.c.bf16 %v1430_v14, %v1430_v14 }
 0x122   : > { %925 = vst.msk [vmem:[#allocation3 + $0x24] sm:$0xf] %vm921_vm2, %v3298_v49  ;;  %931 = vst.msk [vmem:[#allocation3 + $0x6c] sm:$0xf] %vm921_vm2, %v3323_v10  ;;  %v3486_v49 = vpack.c.bf16 %v1685_v6, %v1685_v6  ;;  %v1558_v10 = vld [vmem:[#allocation2 + $0x71] sm:$0xff]  ;;  %v3504_v48 = vpack.c.bf16 %v1681_v7, %v1681_v7  ;;  %v3506_v20 = vpack.c.bf16 %v1682_v17, %v1682_v17  ;;  %1364 = vrot.lane.b32.xlu0 %v3404_v42, %s3147_s14  ;;  %v1197_v7 = vld [vmem:[#allocation2 + $0x19] sm:$0xff] }
 0x123   : > { %1282 = vst.msk [vmem:[#allocation3 + $0x4c] sm:$0xf] %vm792_vm1, %v3449_v59  ;;  %801 = vst.msk [vmem:[#allocation3 + $0x60] sm:$0xf] %vm792_vm1, %v3447_v58  ;;  %v3498_v19 = vpack.c.bf16 %v1558_v10, %v1558_v10  ;;  %v1426_v26 = vld [vmem:[#allocation2 + $0x50] sm:$0xff]  ;;  %1012 = vrot.lane.b32.xlu1 %v3409_v9, %s3148_s15 }
 0x124   : > { %1756 = vst.msk [vmem:[#allocation3 + $0x8] sm:$0xf] %vm792_vm1, %v3460_v1  ;;  %798 = vst.msk [vmem:[#allocation3 + $0x3c] sm:$0xf] %vm792_vm1, %v3464_v60  ;;  %v1687_v22 = vld [vmem:[#allocation2 + $0x7a] sm:$0xff]  ;;  %v1688_v24 = vld [vmem:[#allocation2 + $0x82] sm:$0xff]  ;;  %v3520_v63 = vpack.c.bf16 %v1426_v26, %v1426_v26 }
 0x125   : > { %927 = vst.msk [vmem:[#allocation3 + $0x3c] sm:$0xf] %vm921_vm2, %v3302_v57  ;;  %v1427_v57 = vld [vmem:[#allocation2 + $0x58] sm:$0xff]  ;;  %v3531_v9 = vpack.c.bf16 %v1687_v22, %v1687_v22  ;;  %v3533_v29 = vpack.c.bf16 %v1688_v24, %v1688_v24  ;;  %v1560_v31 = vld [vmem:[#allocation2 + $0x81] sm:$0xff]  ;;  %v939_v41 = vld [vmem:[#allocation2 + $0xa] sm:$0xff] }
 0x126   : > { %1278 = vst.msk [vmem:[#allocation3 + $0x1c] sm:$0xf] %vm792_vm1, %v3476_v56  ;;  %797 = vst.msk [vmem:[#allocation3 + $0x30] sm:$0xf] %vm792_vm1, %v3474_v55  ;;  %v3518_v25 = vpack.c.bf16 %v1427_v57, %v1427_v57  ;;  %v1554_v30 = vld [vmem:[#allocation2 + $0x51] sm:$0xff]  ;;  %v3539_v34 = vpack.c.bf16 %v1560_v31, %v1560_v31  ;;  %v1683_v11 = vld [vmem:[#allocation2 + $0x5a] sm:$0xff]  ;;  %1139 = vrot.lane.b32.xlu0 %v3407_v8, %s3146_s13  ;;  %v2799_v10 = vpack.c.bf16 %v939_v41, %v939_v41 }
 0x127   : > { %1765 = vst.msk [vmem:[#allocation3 + $0x74] sm:$0xf] %vm792_vm1, %v3486_v49  ;;  %1766 = vst.msk [vmem:[#allocation3 + $0x80] sm:$0xf] %vm792_vm1, %v3488_v13  ;;  %v3537_v0 = vpack.c.bf16 %v1554_v30, %v1554_v30  ;;  %v1684_v35 = vld [vmem:[#allocation2 + $0x62] sm:$0xff]  ;;  %1141 = vrot.lane.b32.xlu1 %v3413_v50, %s3146_s13  ;;  %v3553_v47 = vpack.c.bf16 %v1683_v11, %v1683_v11  ;;  %v1201_v8 = vld [vmem:[#allocation2 + $0x39] sm:$0xff]  ;;  %v2846_v50 = vpack.c.bf16 %v1292_v33, %v1292_v33 }
 0x128   : > { %808 = vst.msk [vmem:[#allocation3 + $0xb4] sm:$0xf] %vm792_vm1, %v3490_v32  ;;  %1288 = vst.msk [vmem:[#allocation3 + $0x94] sm:$0xf] %vm792_vm1, %v3498_v19  ;;  %v725_v2 = vld [vmem:[#allocation2 + $0x68] sm:$0xff]  ;;  %v3555_v51 = vpack.c.bf16 %v1684_v35, %v1684_v35  ;;  %v1428_v3 = vld [vmem:[#allocation2 + $0x60] sm:$0xff]  ;;  %v2835_v6 = vpack.c.bf16 %v1201_v8, %v1201_v8  ;;  %v2831_v57 = vpack.c.bf16 %v1197_v7, %v1197_v7 }
 0x129   : > { %937 = vst.msk [vmem:[#allocation3 + $0xb4] sm:$0xf] %vm921_vm2, %v904_v21  ;;  %v3557_v54 = vpack.c.bf16 %v725_v2, %v725_v2  ;;  %v3563_v23 = vpack.c.bf16 %v1428_v3, %v1428_v3  ;;  %v1556_v62 = vld [vmem:[#allocation2 + $0x61] sm:$0xff]  ;;  %v3103_v26 = vld [vmem:[%s4012_s3 + $0x30] sm:$0xff]   ;;  %v3109_v35 = vld [vmem:[%s4012_s3 + $0x18] sm:$0xff]  }
 0x12a   : > { %807 = vst.msk [vmem:[#allocation3 + $0xa8] sm:$0xf] %vm792_vm1, %v3496_v18  ;;  %1761 = vst.msk [vmem:[#allocation3 + $0x44] sm:$0xf] %vm792_vm1, %v3504_v48  ;;  %v3572_v12 = vpack.c.bf16 %v1556_v62, %v1556_v62  ;;  %885 = vrot.lane.b32.xlu0 %v3411_v28, %s3147_s14  ;;  %v3104_v21 = vld [vmem:[%s4012_s3 + $0x68] sm:$0xff]   ;;  %v1293_v24 = vld [vmem:[#allocation2 + $0x1a] sm:$0xff] }
 0x12b   : > { %1762 = vst.msk [vmem:[#allocation3 + $0x50] sm:$0xf] %vm792_vm1, %v3506_v20  ;;  %804 = vst.msk [vmem:[#allocation3 + $0x84] sm:$0xf] %vm792_vm1, %v3518_v25  ;;  %v3093_v16 = vld [vmem:[#allocation3 + $0x8] ss:$12 sps:$4 sm:$0xff]   ;;  %1356 = vrot.lane.b32.xlu1 %v2846_v50, %s3147_s14  ;;  %v2847_v30 = vpack.c.bf16 %v1293_v24, %v1293_v24 }
 0x12c   : > { %803 = vst.msk [vmem:[#allocation3 + $0x78] sm:$0xf] %vm792_vm1, %v3520_v63  ;;  %1767 = vst.msk [vmem:[#allocation3 + $0x8c] sm:$0xf] %vm792_vm1, %v3531_v9  ;;  %3042 = vmatprep.mubr.msk.bf16.mxu0 %vm282_vm0, %v3093_v16  ;;  %v3105_v22 = vld [vmem:[%s4012_s3 + $0x28] sm:$0xff]   ;;  %v3107_v31 = vld [vmem:[%s4012_s3 + $0x20] sm:$0xff]  }
 0x12d   : > { %1768 = vst.msk [vmem:[#allocation3 + $0x98] sm:$0xf] %vm792_vm1, %v3533_v29  ;;  %1284 = vst.msk [vmem:[#allocation3 + $0x64] sm:$0xf] %vm792_vm1, %v3537_v0  ;;  %v1207_v33 = vld [vmem:[#allocation2 + $0x69] sm:$0xff] }
 0x12e   : > { %933 = vst.msk [vmem:[#allocation3 + $0x84] sm:$0xf] %vm921_vm2, %v3367_v4  ;;  %v3094_v4 = vld [vmem:[#allocation3 + $0x20] ss:$12 sps:$4 sm:$0xff]   ;;  %1014 = vrot.lane.b32.xlu0 %v3404_v42, %s3148_s15  ;;  %v3100_v42 = vld [vmem:[%s4012_s3 + $0x78] sm:$0xff]   ;;  %v2841_v11 = vpack.c.bf16 %v1207_v33, %v1207_v33 }
 0x12f   : > { %1290 = vst.msk [vmem:[#allocation3 + $0xac] sm:$0xf] %vm792_vm1, %v3539_v34  ;;  %1763 = vst.msk [vmem:[#allocation3 + $0x5c] sm:$0xf] %vm792_vm1, %v3553_v47  ;;  %3043 = vmatmul.mubr.msk.bf16.vlgmr.msra.gmra.mxu0 %vm282_vm0, %v3094_v4  ;;  %1004 = vrot.lane.b32.xlu1 %v2799_v10, %s3148_s15  ;;  %v3110_v2 = vld [vmem:[%s4012_s3 + $0x50] sm:$0xff]   ;;  %v3112_v3 = vld [vmem:[%s4012_s3 + $0x48] sm:$0xff]  }
 0x130   : > { %1764 = vst.msk [vmem:[#allocation3 + $0x68] sm:$0xf] %vm792_vm1, %v3555_v51  ;;  %806 = vst.msk [vmem:[#allocation3 + $0x9c] sm:$0xf] %vm792_vm1, %v3557_v54  ;;  %2928 = vmatprep.subr.bf16.mxu1 %v3100_v42  ;;  %v3111_v16 = vld [vmem:[%s4012_s3 + $0x10] sm:$0xff]   ;;  %v3115_v4 = vld [vmem:[%s4012_s3] sm:$0xff]  }
 0x131   : > { %935 = vst.msk [vmem:[#allocation3 + $0x9c] sm:$0xf] %vm921_vm2, %v3401_v15  ;;  %v3095_v14 = vld [vmem:[#allocation3 + $0x38] ss:$12 sps:$4 sm:$0xff]  }
 0x132   : > { %805 = vst.msk [vmem:[#allocation3 + $0x90] sm:$0xf] %vm792_vm1, %v3563_v23  ;;  %1281 = vst.msk [vmem:[#allocation3 + $0x40] sm:$0xf] %vm792_vm1, %v2835_v6  ;;  %3046 = vmatprep.mubr.msk.bf16.mxu0 %vm282_vm0, %v3095_v14  ;;  %1131 = vrot.lane.b32.xlu0 %v3424_v37, %s3146_s13  ;;  %v3101_v37 = vld [vmem:[%s4012_s3 + $0x38] sm:$0xff]  }
 0x133   : > { %1286 = vst.msk [vmem:[#allocation3 + $0x7c] sm:$0xf] %vm792_vm1, %v3572_v12  ;;  %1133 = vrot.lane.b32.xlu1 %v3426_v38, %s3146_s13  ;;  %v3098_v17 = vld [vmem:[#allocation3 + $0x80] ss:$12 sps:$4 sm:$0xff]   ;;  %1277 = vst.msk [vmem:[#allocation3 + $0x10] sm:$0xf] %vm792_vm1, %v2831_v57  ;;  %2929 = vmatpush3.bf16.msra.mxu1 %v3101_v37 }
 0x134   : > { %v3099_v38 = vld [vmem:[#allocation3 + $0x98] ss:$12 sps:$4 sm:$0xff]   ;;  %1287 = vst.msk [vmem:[#allocation3 + $0x88] sm:$0xf] %vm792_vm1, %v2841_v11 }
 0x136   : > { %v3096_v15 = vld [vmem:[#allocation3 + $0x50] ss:$12 sps:$4 sm:$0xff]   ;;  %877 = vrot.lane.b32.xlu0 %v3428_v39, %s3147_s14  ;;  %v3102_v39 = vld [vmem:[%s4012_s3 + $0x70] sm:$0xff]  }
 0x137   : > { %3047 = vmatmul.mubr.msk.bf16.gmra.mxu0 %vm282_vm0, %v3096_v15  ;;  %v3097_v28 = vld [vmem:[#allocation3 + $0x68] ss:$12 sps:$4 sm:$0xff]   ;;  %1366 = vrot.lane.b32.xlu1 %v3436_v40, %s3147_s14 }
 0x138   : > { %3050 = vmatprep.mubr.msk.bf16.mxu0 %vm282_vm0, %v3097_v28  ;;  %2930 = vmatprep.subr.bf16.mxu1 %v3102_v39 }
 0x139   : > { %2931 = vmatpush3.bf16.msra.mxu1 %v3103_v26  ;;  %v1691_v26 = vld [vmem:[#allocation2 + $0x9a] sm:$0xff] }
 0x13a   : > { %1006 = vrot.lane.b32.xlu0 %v2846_v50, %s3148_s15  ;;  %2932 = vmatprep.subr.bf16.mxu1 %v3104_v21 }
 0x13b   : > { %1494 = vrot.lane.b32.xlu1 %v3441_v44, %s3148_s15 }
 0x13d   : > { %2933 = vmatpush3.bf16.msra.mxu1 %v3105_v22  ;;  %v2909_v22 = vpack.c.bf16 %v1691_v26, %v1691_v26 }
 0x13e   : > { %1492 = vrot.lane.b32.xlu0 %v3447_v58, %s3148_s15 }
 0x13f   : > { %3051 = vmatmul.mubr.msk.bf16.gmra.mxu0 %vm282_vm0, %v3098_v17  ;;  %1016 = vrot.lane.b32.xlu1 %v3436_v40, %s3148_s15  ;;  %v3106_v40 = vld [vmem:[%s4012_s3 + $0x60] sm:$0xff]   ;;  %1771 = vst.msk [vmem:[#allocation3 + $0xbc] sm:$0xf] %vm792_vm1, %v2909_v22 }
 0x140   : > { %3054 = vmatprep.mubr.msk.bf16.mxu0 %vm282_vm0, %v3099_v38  ;;  %2934 = vmatprep.subr.bf16.mxu1 %v3106_v40 }
 0x141   : > { %2935 = vmatpush3.bf16.msra.mxu1 %v3107_v31 }
 0x142   : > { %1620 = vrot.lane.b32.xlu0 %v3449_v59, %s3146_s13 }
 0x143   : > { %1145 = vrot.lane.b32.xlu1 %v3441_v44, %s3146_s13  ;;  %v3108_v44 = vld [vmem:[%s4012_s3 + $0x58] sm:$0xff]  }
 0x144   : > { %2936 = vmatprep.subr.bf16.mxu1 %v3108_v44 }
 0x145   : > { %2937 = vmatpush3.bf16.msra.mxu1 %v3109_v35 }
 0x146   : > { %1368 = vrot.lane.b32.xlu0 %v3439_v43, %s3147_s14  ;;  %2938 = vmatprep.subr.bf16.mxu1 %v3110_v2 }
 0x147   : > { %1358 = vrot.lane.b32.xlu1 %v2847_v30, %s3147_s14 }
 0x149   : > { %2939 = vmatpush3.bf16.msra.mxu1 %v3111_v16 }
 0x14a   : > { %1143 = vrot.lane.b32.xlu0 %v3447_v58, %s3146_s13  ;;  %2940 = vmatprep.subr.bf16.mxu1 %v3112_v3  ;;  %v3113_v58 = vld [vmem:[%s4012_s3 + $0x8] sm:$0xff]  }
 0x14b   : > { %1486 = vrot.lane.b32.xlu1 %v3464_v60, %s3148_s15 }
 0x14d   : > { %2941 = vmatpush3.bf16.msra.mxu1 %v3113_v58 }
 0x14e   : > { %889 = vrot.lane.b32.xlu0 %v3449_v59, %s3147_s14  ;;  %v3114_v59 = vld [vmem:[%s4012_s3 + $0x40] sm:$0xff]  }
 0x14f   : > { %1008 = vrot.lane.b32.xlu1 %v2847_v30, %s3148_s15  ;;  %2942 = vmatprep.subr.bf16.mxu1 %v3114_v59  ;;  %v1434_v30 = vld [vmem:[#allocation2 + $0x90] sm:$0xff] }
 0x150   : > { %v2876_v44 = vpack.c.bf16 %v1434_v30, %v1434_v30 }
 0x151   : > { %2943 = vmatpush3.bf16.msra.mxu1 %v3115_v4 }
 0x152   : > { %1018 = vrot.lane.b32.xlu0 %v3439_v43, %s3148_s15  ;;  %v1209_v43 = vld [vmem:[#allocation2 + $0x79] sm:$0xff] }
 0x153   : > { %1137 = vrot.lane.b32.xlu1 %v3464_v60, %s3146_s13  ;;  %v1203_v60 = vld [vmem:[#allocation2 + $0x49] sm:$0xff]  ;;  %v2843_v62 = vpack.c.bf16 %v1209_v43, %v1209_v43 }
 0x154   : > { %v2837_v8 = vpack.c.bf16 %v1203_v60, %v1203_v60 }
 0x155   : > { %1289 = vst.msk [vmem:[#allocation3 + $0xa0] sm:$0xf] %vm792_vm1, %v2843_v62 }
 0x156   : > { %1484 = vrot.lane.b32.xlu0 %v3474_v55, %s3148_s15  ;;  %1283 = vst.msk [vmem:[#allocation3 + $0x58] sm:$0xf] %vm792_vm1, %v2837_v8 }
 0x157   : > { %1378 = vrot.lane.b32.xlu1 %v3486_v49, %s3147_s14 }
 0x15a   : > { %1612 = vrot.lane.b32.xlu0 %v3476_v56, %s3146_s13 }
 0x15b   : > { %1506 = vrot.lane.b32.xlu1 %v3490_v32, %s3148_s15 }
 0x15e   : > { %1360 = vrot.lane.b32.xlu0 %v3460_v1, %s3147_s14 }
 0x15f   : > { %1028 = vrot.lane.b32.xlu1 %v3486_v49, %s3148_s15 }
 0x162   : > { %1135 = vrot.lane.b32.xlu0 %v3474_v55, %s3146_s13  ;;  %v1205_v55 = vld [vmem:[#allocation2 + $0x59] sm:$0xff] }
 0x163   : > { %1157 = vrot.lane.b32.xlu1 %v3490_v32, %s3146_s13  ;;  %v2839_v49 = vpack.c.bf16 %v1205_v55, %v1205_v55 }
 0x165   : > { %1285 = vst.msk [vmem:[#allocation3 + $0x70] sm:$0xf] %vm792_vm1, %v2839_v49 }
 0x166   : > { %881 = vrot.lane.b32.xlu0 %v3476_v56, %s3147_s14  ;;  %v1433_v56 = vld [vmem:[#allocation2 + $0x88] sm:$0xff] }
 0x167   : > { %1370 = vrot.lane.b32.xlu1 %v3504_v48, %s3147_s14 }
 0x16a   : > { %1010 = vrot.lane.b32.xlu0 %v3460_v1, %s3148_s15  ;;  %v1211_v1 = vld [vmem:[#allocation2 + $0x89] sm:$0xff] }
 0x16b   : > { %1498 = vrot.lane.b32.xlu1 %v3518_v25, %s3148_s15  ;;  %v2845_v32 = vpack.c.bf16 %v1211_v1, %v1211_v1 }
 0x16d   : > { %1291 = vst.msk [vmem:[#allocation3 + $0xb8] sm:$0xf] %vm792_vm1, %v2845_v32 }
 0x16e   : > { %1504 = vrot.lane.b32.xlu0 %v3496_v18, %s3148_s15 }
 0x16f   : > { %1020 = vrot.lane.b32.xlu1 %v3504_v48, %s3148_s15  ;;  %v2875_v48 = vpack.c.bf16 %v1433_v56, %v1433_v56 }
 0x172   : > { %1632 = vrot.lane.b32.xlu0 %v3498_v19, %s3146_s13 }
 0x173   : > { %1149 = vrot.lane.b32.xlu1 %v3518_v25, %s3146_s13 }
 0x176   : > { %1380 = vrot.lane.b32.xlu0 %v3488_v13, %s3147_s14 }
 0x177   : > { %1382 = vrot.lane.b32.xlu1 %v3531_v9, %s3147_s14 }
 0x17a   : > { %1155 = vrot.lane.b32.xlu0 %v3496_v18, %s3146_s13 }
 0x17b   : > { %1510 = vrot.lane.b32.xlu1 %v2875_v48, %s3148_s15 }
 0x17e   : > { %901 = vrot.lane.b32.xlu0 %v3498_v19, %s3147_s14 }
 0x17f   : > { %1374 = vrot.lane.b32.xlu1 %v3553_v47, %s3147_s14 }
 0x182   : > { %1496 = vrot.lane.b32.xlu0 %v3520_v63, %s3148_s15 }
 0x183   : > { %1502 = vrot.lane.b32.xlu1 %v3557_v54, %s3148_s15 }
 0x186   : > { %1624 = vrot.lane.b32.xlu0 %v3537_v0, %s3146_s13 }
 0x187   : > { %1386 = vrot.lane.b32.xlu1 %v3292_v45, %s3147_s14  ;;  %v1435_v45 = vld [vmem:[#allocation2 + $0x98] sm:$0xff] }
 0x18a   : > { %1372 = vrot.lane.b32.xlu0 %v3506_v20, %s3147_s14 }
 0x18b   : > { %1024 = vrot.lane.b32.xlu1 %v3553_v47, %s3148_s15  ;;  %v2877_v47 = vpack.c.bf16 %v1435_v45, %v1435_v45 }
 0x18c   : > { %v3735_v18 = vpop.permute.xlu0 %1488  ;;  %v1363_v19 = vpop.permute.xlu1 %1362 }
 0x18d   : > { %1407 = vst.msk [vmem:[#allocation3 + $0x28] sm:$0xf] %vm921_vm2, %v1363_v19 }
 0x18e   : > { %1147 = vrot.lane.b32.xlu0 %v3520_v63, %s3146_s13  ;;  %v1432_v63 = vld [vmem:[#allocation2 + $0x80] sm:$0xff] }
 0x18f   : > { %1153 = vrot.lane.b32.xlu1 %v3557_v54, %s3146_s13  ;;  %v3758_v14 = vpack.c.bf16 %v1432_v63, %v1432_v63 }
 0x190   : > { %v3742_v25 = vpop.permute.xlu0 %1616  ;;  %v1491_v50 = vpop.permute.xlu1 %1490 }
 0x191   : > { %1535 = vst.msk [vmem:[#allocation3 + $0x28] sm:$0xf] %vm1050_vm3, %v1491_v50 }
 0x192   : > { %1663 = vst.msk [vmem:[#allocation3 + $0x28] sm:$0xf] %vm1179_vm4, %v3300_v53  ;;  %893 = vrot.lane.b32.xlu0 %v3537_v0, %s3147_s14  ;;  %v1563_v53 = vld [vmem:[#allocation2 + $0x99] sm:$0xff] }
 0x193   : > { %1032 = vrot.lane.b32.xlu1 %v3531_v9, %s3148_s15  ;;  %v2893_v0 = vpack.c.bf16 %v1563_v53, %v1563_v53 }
 0x194   : > { %v1365_v54 = vpop.permute.xlu0 %1364 }
 0x195   : > { %v1013_v6 = vpop.permute.xlu1 %1012  ;;  %1408 = vst.msk [vmem:[#allocation3 + $0x34] sm:$0xf] %vm921_vm2, %v1365_v54 }
 0x196   : > { %1056 = vst.msk [vmem:[#allocation3 + $0x3c] sm:$0xf] %vm1050_vm3, %v1013_v6  ;;  %1022 = vrot.lane.b32.xlu0 %v3506_v20, %s3148_s15 }
 0x197   : > { %1514 = vrot.lane.b32.xlu1 %v2877_v47, %s3148_s15 }
 0x198   : > { %v3756_v41 = vpop.permute.xlu0 %1139 }
 0x199   : > { %v1142_v9 = vpop.permute.xlu1 %1141 }
 0x19a   : > { %1185 = vst.msk [vmem:[#allocation3 + $0x3c] sm:$0xf] %vm1179_vm4, %v1142_v9  ;;  %1508 = vrot.lane.b32.xlu0 %v3758_v14, %s3148_s15 }
 0x19b   : > { %1161 = vrot.lane.b32.xlu1 %v2875_v48, %s3146_s13 }
 0x19c   : > { %v886_v10 = vpop.permute.xlu0 %885 }
 0x19d   : > { %v1357_v15 = vpop.permute.xlu1 %1356  ;;  %928 = vst.msk [vmem:[#allocation3 + $0x48] sm:$0xf] %vm921_vm2, %v886_v10 }
 0x19e   : > { %1404 = vst.msk [vmem:[#allocation3 + $0x4] sm:$0xf] %vm921_vm2, %v1357_v15  ;;  %1636 = vrot.lane.b32.xlu0 %v3539_v34, %s3146_s13 }
 0x19f   : > { %1642 = vrot.lane.b32.xlu1 %v2893_v0, %s3146_s13 }
 0x1a0   : > { %v1015_v20 = vpop.permute.xlu0 %1014 }
 0x1a1   : > { %v1005_v28 = vpop.permute.xlu1 %1004  ;;  %1057 = vst.msk [vmem:[#allocation3 + $0x48] sm:$0xf] %vm1050_vm3, %v1015_v20 }
 0x1a2   : > { %1052 = vst.msk [vmem:[#allocation3 + $0xc] sm:$0xf] %vm1050_vm3, %v1005_v28  ;;  %1384 = vrot.lane.b32.xlu0 %v3533_v29, %s3147_s14 }
 0x1a4   : > { %v1132_v42 = vpop.permute.xlu0 %1131 }
 0x1a5   : > { %v1134_v7 = vpop.permute.xlu1 %1133  ;;  %1180 = vst.msk [vmem:[#allocation3] sm:$0xf] %vm1179_vm4, %v1132_v42 }
 0x1a6   : > { %1181 = vst.msk [vmem:[#allocation3 + $0xc] sm:$0xf] %vm1179_vm4, %v1134_v7  ;;  %1500 = vrot.lane.b32.xlu0 %v3563_v23, %s3148_s15 }
 0x1a8   : > { %v878_v34 = vpop.permute.xlu0 %877 }
 0x1a9   : > { %v1367_v17 = vpop.permute.xlu1 %1366  ;;  %924 = vst.msk [vmem:[#allocation3 + $0x18] sm:$0xf] %vm921_vm2, %v878_v34 }
 0x1aa   : > { %1409 = vst.msk [vmem:[#allocation3 + $0x40] sm:$0xf] %vm921_vm2, %v1367_v17  ;;  %1030 = vrot.lane.b32.xlu0 %v3488_v13, %s3148_s15 }
 0x1ac   : > { %v1007_v29 = vpop.permute.xlu0 %1006 }
 0x1ad   : > { %v1495_v57 = vpop.permute.xlu1 %1494  ;;  %1053 = vst.msk [vmem:[#allocation3 + $0x18] sm:$0xf] %vm1050_vm3, %v1007_v29  ;;  %v3116_v62 = vld [vmem:[#allocation3] ss:$12 sps:$4 sm:$0xff]  }
 0x1ae   : > { %1537 = vst.msk [vmem:[#allocation3 + $0x40] sm:$0xf] %vm1050_vm3, %v1495_v57  ;;  %1628 = vrot.lane.b32.xlu0 %v3572_v12, %s3146_s13 }
 0x1af   : > { %1665 = vst.msk [vmem:[#allocation3 + $0x40] sm:$0xf] %vm1179_vm4, %v3304_v61  ;;  %v1690_v61 = vld [vmem:[#allocation2 + $0x92] sm:$0xff] }
 0x1b0   : > { %v1493_v38 = vpop.permute.xlu0 %1492  ;;  %v2908_v21 = vpack.c.bf16 %v1690_v61, %v1690_v61 }
 0x1b1   : > { %v1017_v37 = vpop.permute.xlu1 %1016  ;;  %1536 = vst.msk [vmem:[#allocation3 + $0x34] sm:$0xf] %vm1050_vm3, %v1493_v38 }
 0x1b2   : > { %1058 = vst.msk [vmem:[#allocation3 + $0x54] sm:$0xf] %vm1050_vm3, %v1017_v37  ;;  %1376 = vrot.lane.b32.xlu0 %v3555_v51, %s3147_s14 }
 0x1b3   : > { %1770 = vst.msk [vmem:[#allocation3 + $0xb0] sm:$0xf] %vm792_vm1, %v2908_v21 }
 0x1b4   : > { %v1621_v39 = vpop.permute.xlu0 %1620 }
 0x1b5   : > { %v1146_v13 = vpop.permute.xlu1 %1145  ;;  %1664 = vst.msk [vmem:[#allocation3 + $0x34] sm:$0xf] %vm1179_vm4, %v1621_v39 }
 0x1b6   : > { %1187 = vst.msk [vmem:[#allocation3 + $0x54] sm:$0xf] %vm1179_vm4, %v1146_v13  ;;  %1151 = vrot.lane.b32.xlu0 %v3563_v23, %s3146_s13 }
 0x1b8   : > { %v1369_v40 = vpop.permute.xlu0 %1368 }
 0x1b9   : > { %v1359_v24 = vpop.permute.xlu1 %1358  ;;  %1410 = vst.msk [vmem:[#allocation3 + $0x4c] sm:$0xf] %vm921_vm2, %v1369_v40 }
 0x1ba   : > { %1405 = vst.msk [vmem:[#allocation3 + $0x10] sm:$0xf] %vm921_vm2, %v1359_v24  ;;  %897 = vrot.lane.b32.xlu0 %v3572_v12, %s3147_s14  ;;  %v3133_v35 = vld [vmem:[#allocation3 + $0xb0] ss:$12 sps:$4 sm:$0xff]  }
 0x1bb   : > { %3055 = vmatmul.mubr.msk.bf16.gmra.mxu0 %vm282_vm0, %v3133_v35  ;;  %v1562_v12 = vld [vmem:[#allocation2 + $0x91] sm:$0xff] }
 0x1bc   : > { %v1144_v23 = vpop.permute.xlu0 %1143  ;;  %v3121_v54 = vld [vmem:[#allocation3 + $0x34] ss:$12 sps:$4 sm:$0xff]  }
 0x1bd   : > { %v1487_v31 = vpop.permute.xlu1 %1486  ;;  %1186 = vst.msk [vmem:[#allocation3 + $0x48] sm:$0xf] %vm1179_vm4, %v1144_v23 }
 0x1be   : > { %1533 = vst.msk [vmem:[#allocation3 + $0x10] sm:$0xf] %vm1050_vm3, %v1487_v31  ;;  %1026 = vrot.lane.b32.xlu0 %v3555_v51, %s3148_s15 }
 0x1bf   : > { %1661 = vst.msk [vmem:[#allocation3 + $0x10] sm:$0xf] %vm1179_vm4, %v3296_v46  ;;  %v2892_v46 = vpack.c.bf16 %v1562_v12, %v1562_v12 }
 0x1c0   : > { %v890_v11 = vpop.permute.xlu0 %889 }
 0x1c1   : > { %v1009_v33 = vpop.permute.xlu1 %1008  ;;  %930 = vst.msk [vmem:[#allocation3 + $0x60] sm:$0xf] %vm921_vm2, %v890_v11 }
 0x1c2   : > { %1054 = vst.msk [vmem:[#allocation3 + $0x24] sm:$0xf] %vm1050_vm3, %v1009_v33  ;;  %1512 = vrot.lane.b32.xlu0 %v2876_v44, %s3148_s15 }
 0x1c4   : > { %v1019_v16 = vpop.permute.xlu0 %1018 }
 0x1c5   : > { %v1138_v2 = vpop.permute.xlu1 %1137  ;;  %1059 = vst.msk [vmem:[#allocation3 + $0x60] sm:$0xf] %vm1050_vm3, %v1019_v16 }
 0x1c6   : > { %1183 = vst.msk [vmem:[#allocation3 + $0x24] sm:$0xf] %vm1179_vm4, %v1138_v2  ;;  %1159 = vrot.lane.b32.xlu0 %v3758_v14, %s3146_s13 }
 0x1c8   : > { %v1485_v3 = vpop.permute.xlu0 %1484 }
 0x1c9   : > { %v1379_v51 = vpop.permute.xlu1 %1378  ;;  %1532 = vst.msk [vmem:[#allocation3 + $0x4] sm:$0xf] %vm1050_vm3, %v1485_v3 }
 0x1ca   : > { %1415 = vst.msk [vmem:[#allocation3 + $0x88] sm:$0xf] %vm921_vm2, %v1379_v51  ;;  %1640 = vrot.lane.b32.xlu0 %v2892_v46, %s3146_s13 }
 0x1cc   : > { %v1613_v59 = vpop.permute.xlu0 %1612 }
 0x1cd   : > { %v1507_v58 = vpop.permute.xlu1 %1506  ;;  %1660 = vst.msk [vmem:[#allocation3 + $0x4] sm:$0xf] %vm1179_vm4, %v1613_v59  ;;  %v1778_v48 = vld [vmem:[#allocation3 + $0x24] sm:$0xff] }
 0x1ce   : > { %1543 = vst.msk [vmem:[#allocation3 + $0x88] sm:$0xf] %vm1050_vm3, %v1507_v58 }
 0x1cf   : > { %1671 = vst.msk [vmem:[#allocation3 + $0x88] sm:$0xf] %vm1179_vm4, %v3384_v36 }
 0x1d0   : > { %v1361_v60 = vpop.permute.xlu0 %1360 }
 0x1d1   : > { %v1029_v4 = vpop.permute.xlu1 %1028  ;;  %1406 = vst.msk [vmem:[#allocation3 + $0x1c] sm:$0xf] %vm921_vm2, %v1361_v60 }
 0x1d2   : > { %1064 = vst.msk [vmem:[#allocation3 + $0x9c] sm:$0xf] %vm1050_vm3, %v1029_v4  ;;  %1534 = vst.msk [vmem:[#allocation3 + $0x1c] sm:$0xf] %vm1050_vm3, %v3735_v18 }
 0x1d3   : > { %1662 = vst.msk [vmem:[#allocation3 + $0x1c] sm:$0xf] %vm1179_vm4, %v3742_v25 }
 0x1d4   : > { %v1136_v43 = vpop.permute.xlu0 %1135  ;;  %v3118_v55 = vld [vmem:[#allocation3 + $0x4] ss:$12 sps:$4 sm:$0xff]  }
 0x1d5   : > { %v1158_v8 = vpop.permute.xlu1 %1157  ;;  %1182 = vst.msk [vmem:[#allocation3 + $0x18] sm:$0xf] %vm1179_vm4, %v1136_v43  ;;  %2131 = vmatprep.mubr.bf16.mxu1 %v3118_v55 }
 0x1d6   : > { %1193 = vst.msk [vmem:[#allocation3 + $0x9c] sm:$0xf] %vm1179_vm4, %v1158_v8  ;;  %2132 = vmatmul.mubr.bf16.vlgmr.msra.gmra.mxu1 %v3116_v62 }
 0x1d8   : > { %v882_v49 = vpop.permute.xlu0 %881 }
 0x1d9   : > { %v1371_v36 = vpop.permute.xlu1 %1370  ;;  %926 = vst.msk [vmem:[#allocation3 + $0x30] sm:$0xf] %vm921_vm2, %v882_v49 }
 0x1da   : > { %1411 = vst.msk [vmem:[#allocation3 + $0x58] sm:$0xf] %vm921_vm2, %v1371_v36  ;;  %v3119_v18 = vld [vmem:[#allocation3 + $0x1c] ss:$12 sps:$4 sm:$0xff]  }
 0x1db   : > { %2139 = vmatprep.mubr.bf16.mxu1 %v3119_v18 }
 0x1dc   : > { %v1011_v1 = vpop.permute.xlu0 %1010  ;;  %v1776_v32 = vld [vmem:[#allocation3 + $0x18] sm:$0xff] }
 0x1dd   : > { %v1499_v56 = vpop.permute.xlu1 %1498  ;;  %1055 = vst.msk [vmem:[#allocation3 + $0x30] sm:$0xf] %vm1050_vm3, %v1011_v1  ;;  %v2717_v19 = vcombine.low %v1776_v32, %v1778_v48 }
 0x1de   : > { %1539 = vst.msk [vmem:[#allocation3 + $0x58] sm:$0xf] %vm1050_vm3, %v1499_v56 }
 0x1df   : > { %1667 = vst.msk [vmem:[#allocation3 + $0x58] sm:$0xf] %vm1179_vm4, %v3316_v5  ;;  %1184 = vst.msk [vmem:[#allocation3 + $0x30] sm:$0xf] %vm1179_vm4, %v3756_v41  ;;  %2140 = vmatmul.mubr.bf16.gmra.mxu1 %v2717_v19 }
 0x1e0   : > { %v3838_v25 = vpop.permute.xlu0 %1504  ;;  %2147 = vmatprep.mubr.bf16.mxu1 %v3121_v54 }
 0x1e1   : > { %v1021_v45 = vpop.permute.xlu1 %1020 }
 0x1e2   : > { %1060 = vst.msk [vmem:[#allocation3 + $0x6c] sm:$0xf] %vm1050_vm3, %v1021_v45 }
 0x1e4   : > { %v3841_v47 = vpop.permute.xlu0 %1632 }
 0x1e5   : > { %v1150_v50 = vpop.permute.xlu1 %1149 }
 0x1e6   : > { %1189 = vst.msk [vmem:[#allocation3 + $0x6c] sm:$0xf] %vm1179_vm4, %v1150_v50  ;;  %v3123_v6 = vld [vmem:[#allocation3 + $0x30] ss:$12 sps:$4 sm:$0xff]   ;;  %v1786_v34 = vld [vmem:[#allocation3 + $0x54] sm:$0xff] }
 0x1e7   : > { %2148 = vmatmul.mubr.bf16.gmra.mxu1 %v3123_v6 }
 0x1e8   : > { %v1381_v5 = vpop.permute.xlu0 %1380 }
 0x1e9   : > { %v1383_v63 = vpop.permute.xlu1 %1382  ;;  %1416 = vst.msk [vmem:[#allocation3 + $0x94] sm:$0xf] %vm921_vm2, %v1381_v5 }
 0x1ea   : > { %1417 = vst.msk [vmem:[#allocation3 + $0xa0] sm:$0xf] %vm921_vm2, %v1383_v63 }
 0x1ec   : > { %v3846_v41 = vpop.permute.xlu0 %1155 }
 0x1ed   : > { %v1511_v53 = vpop.permute.xlu1 %1510 }
 0x1ee   : > { %1545 = vst.msk [vmem:[#allocation3 + $0xa0] sm:$0xf] %vm1050_vm3, %v1511_v53 }
 0x1ef   : > { %1673 = vst.msk [vmem:[#allocation3 + $0xa0] sm:$0xf] %vm1179_vm4, %v3445_v52  ;;  %v3044_v19 = vpop.f32.mrf.mxu0 }
 0x1f0   : > { %v902_v14 = vpop.permute.xlu0 %901 }
 0x1f1   : > { %v1375_v9 = vpop.permute.xlu1 %1374  ;;  %936 = vst.msk [vmem:[#allocation3 + $0xa8] sm:$0xf] %vm921_vm2, %v902_v14 }
 0x1f2   : > { %1413 = vst.msk [vmem:[#allocation3 + $0x70] sm:$0xf] %vm921_vm2, %v1375_v9 }
 0x1f4   : > { %v1497_v10 = vpop.permute.xlu0 %1496 }
 0x1f5   : > { %v1503_v0 = vpop.permute.xlu1 %1502  ;;  %1538 = vst.msk [vmem:[#allocation3 + $0x4c] sm:$0xf] %vm1050_vm3, %v1497_v10 }
 0x1f6   : > { %1541 = vst.msk [vmem:[#allocation3 + $0x70] sm:$0xf] %vm1050_vm3, %v1503_v0 }
 0x1f7   : > { %1669 = vst.msk [vmem:[#allocation3 + $0x70] sm:$0xf] %vm1179_vm4, %v3346_v27 }
 0x1f8   : > { %v1625_v20 = vpop.permute.xlu0 %1624 }
 0x1f9   : > { %v1387_v15 = vpop.permute.xlu1 %1386  ;;  %1666 = vst.msk [vmem:[#allocation3 + $0x4c] sm:$0xf] %vm1179_vm4, %v1625_v20 }
 0x1fa   : > { %1419 = vst.msk [vmem:[#allocation3 + $0xb8] sm:$0xf] %vm921_vm2, %v1387_v15 }
 0x1fc   : > { %v1373_v28 = vpop.permute.xlu0 %1372 }
 0x1fd   : > { %v1025_v52 = vpop.permute.xlu1 %1024  ;;  %1412 = vst.msk [vmem:[#allocation3 + $0x64] sm:$0xf] %vm921_vm2, %v1373_v28 }
 0x1fe   : > { %1062 = vst.msk [vmem:[#allocation3 + $0x84] sm:$0xf] %vm1050_vm3, %v1025_v52  ;;  %v1790_v33 = vld [vmem:[#allocation3 + $0x6c] sm:$0xff] }
 0x200   : > { %v1148_v7 = vpop.permute.xlu0 %1147  ;;  %v1784_v17 = vld [vmem:[#allocation3 + $0x48] sm:$0xff] }
 0x201   : > { %v1154_v42 = vpop.permute.xlu1 %1153  ;;  %v3124_v57 = vld [vmem:[#allocation3 + $0x4c] ss:$12 sps:$4 sm:$0xff]   ;;  %1188 = vst.msk [vmem:[#allocation3 + $0x60] sm:$0xf] %vm1179_vm4, %v1148_v7  ;;  %v2723_v27 = vcombine.low %v1784_v17, %v1786_v34 }
 0x202   : > { %1191 = vst.msk [vmem:[#allocation3 + $0x84] sm:$0xf] %vm1179_vm4, %v1154_v42  ;;  %2155 = vmatprep.mubr.bf16.mxu1 %v3124_v57  ;;  %v3891_v7 = vld [vmem:[%s4013_s4] ss:$0 sm:$0xff] }
 0x203   : > { %2156 = vmatmul.mubr.bf16.gmra.mxu1 %v2723_v27 }
 0x204   : > { %v894_v37 = vpop.permute.xlu0 %893 }
 0x205   : > { %v1033_v29 = vpop.permute.xlu1 %1032  ;;  %932 = vst.msk [vmem:[#allocation3 + $0x78] sm:$0xf] %vm921_vm2, %v894_v37 }
 0x206   : > { %1066 = vst.msk [vmem:[#allocation3 + $0xb4] sm:$0xf] %vm1050_vm3, %v1033_v29 }
 0x208   : > { %v1023_v13 = vpop.permute.xlu0 %1022 }
 0x209   : > { %v1515_v38 = vpop.permute.xlu1 %1514  ;;  %1061 = vst.msk [vmem:[#allocation3 + $0x78] sm:$0xf] %vm1050_vm3, %v1023_v13  ;;  %v1794_v46 = vld [vmem:[#allocation3 + $0x84] sm:$0xff] }
 0x20a   : > { %1547 = vst.msk [vmem:[#allocation3 + $0xb8] sm:$0xf] %vm1050_vm3, %v1515_v38 }
 0x20c   : > { %v1509_v61 = vpop.permute.xlu0 %1508 }
 0x20d   : > { %v1162_v39 = vpop.permute.xlu1 %1161  ;;  %1544 = vst.msk [vmem:[#allocation3 + $0x94] sm:$0xf] %vm1050_vm3, %v1509_v61 }
 0x20e   : > { %1195 = vst.msk [vmem:[#allocation3 + $0xb4] sm:$0xf] %vm1179_vm4, %v1162_v39 }
 0x210   : > { %v1637_v21 = vpop.permute.xlu0 %1636 }
 0x211   : > { %v1643_v26 = vpop.permute.xlu1 %1642  ;;  %1672 = vst.msk [vmem:[#allocation3 + $0x94] sm:$0xf] %vm1179_vm4, %v1637_v21 }
 0x212   : > { %1675 = vst.msk [vmem:[#allocation3 + $0xb8] sm:$0xf] %vm1179_vm4, %v1643_v26 }
 0x214   : > { %v1385_v22 = vpop.permute.xlu0 %1384 }
 0x215   : > { %1418 = vst.msk [vmem:[#allocation3 + $0xac] sm:$0xf] %vm921_vm2, %v1385_v22 }
 0x218   : > { %v1501_v24 = vpop.permute.xlu0 %1500  ;;  %v3130_v4 = vld [vmem:[#allocation3 + $0x94] ss:$12 sps:$4 sm:$0xff]  }
 0x219   : > { %1540 = vst.msk [vmem:[#allocation3 + $0x64] sm:$0xf] %vm1050_vm3, %v1501_v24 }
 0x21c   : > { %v1031_v40 = vpop.permute.xlu0 %1030 }
 0x21d   : > { %1065 = vst.msk [vmem:[#allocation3 + $0xa8] sm:$0xf] %vm1050_vm3, %v1031_v40 }
 0x220   : > { %v1629_v30 = vpop.permute.xlu0 %1628 }
 0x221   : > { %1668 = vst.msk [vmem:[#allocation3 + $0x64] sm:$0xf] %vm1179_vm4, %v1629_v30 }
 0x224   : > { %v1377_v31 = vpop.permute.xlu0 %1376 }
 0x225   : > { %1414 = vst.msk [vmem:[#allocation3 + $0x7c] sm:$0xf] %vm921_vm2, %v1377_v31 }
 0x226   : > { %1542 = vst.msk [vmem:[#allocation3 + $0x7c] sm:$0xf] %vm1050_vm3, %v3838_v25  ;;  %v2230_v25 = vpop.f32.mrf.mxu0 }
 0x227   : > { %1670 = vst.msk [vmem:[#allocation3 + $0x7c] sm:$0xf] %vm1179_vm4, %v3841_v47 }
 0x228   : > { %v1152_v23 = vpop.permute.xlu0 %1151  ;;  %v1788_v44 = vld [vmem:[#allocation3 + $0x60] sm:$0xff]  ;;  %v3045_v47 = vpop.f32.mrf.mxu0 }
 0x229   : > { %v3126_v11 = vld [vmem:[#allocation3 + $0x64] ss:$12 sps:$4 sm:$0xff]   ;;  %1190 = vst.msk [vmem:[#allocation3 + $0x78] sm:$0xf] %vm1179_vm4, %v1152_v23  ;;  %v2726_v35 = vcombine.low %v1788_v44, %v1790_v33 }
 0x22a   : > { %2163 = vmatprep.mubr.bf16.mxu1 %v3126_v11  ;;  %v2233_v6 = vpop.f32.mrf.mxu0 }
 0x22b   : > { %2164 = vmatmul.mubr.bf16.gmra.mxu1 %v2726_v35 }
 0x22c   : > { %v898_v12 = vpop.permute.xlu0 %897  ;;  %v3048_v5 = vpop.f32.mrf.mxu0 }
 0x22d   : > { %934 = vst.msk [vmem:[#allocation3 + $0x90] sm:$0xf] %vm921_vm2, %v898_v12 }
 0x22e   : > { %v3128_v51 = vld [vmem:[#allocation3 + $0x7c] ss:$12 sps:$4 sm:$0xff]  }
 0x22f   : > { %2171 = vmatprep.mubr.bf16.mxu1 %v3128_v51 }
 0x230   : > { %v1027_v2 = vpop.permute.xlu0 %1026  ;;  %v1792_v16 = vld [vmem:[#allocation3 + $0x78] sm:$0xff] }
 0x231   : > { %1063 = vst.msk [vmem:[#allocation3 + $0x90] sm:$0xf] %vm1050_vm3, %v1027_v2  ;;  %v2729_v3 = vcombine.low %v1792_v16, %v1794_v46 }
 0x232   : > { %1192 = vst.msk [vmem:[#allocation3 + $0x90] sm:$0xf] %vm1179_vm4, %v3846_v41  ;;  %v2246_v41 = vpop.f32.mrf.mxu0 }
 0x233   : > { %2172 = vmatmul.mubr.bf16.gmra.mxu1 %v2729_v3 }
 0x234   : > { %v1513_v58 = vpop.permute.xlu0 %1512  ;;  %2179 = vmatprep.mubr.bf16.mxu1 %v3130_v4  ;;  %v3049_v14 = vpop.f32.mrf.mxu0 }
 0x235   : > { %1546 = vst.msk [vmem:[#allocation3 + $0xac] sm:$0xf] %vm1050_vm3, %v1513_v58 }
 0x236   : > { %v2249_v52 = vpop.f32.mrf.mxu0 }
 0x238   : > { %v1160_v59 = vpop.permute.xlu0 %1159  ;;  %v3052_v38 = vpop.f32.mrf.mxu0 }
 0x239   : > { %1194 = vst.msk [vmem:[#allocation3 + $0xa8] sm:$0xf] %vm1179_vm4, %v1160_v59  ;;  %v3132_v60 = vld [vmem:[#allocation3 + $0x90] ss:$12 sps:$4 sm:$0xff]  }
 0x23a   : > { %v2262_v31 = vpop.f32.mrf.mxu0 }
 0x23b   : > { %2180 = vmatmul.mubr.bf16.gmra.mxu1 %v3132_v60 }
 0x23c   : > { %v1641_v8 = vpop.permute.xlu0 %1640  ;;  %v3053_v59 = vpop.f32.mrf.mxu0 }
 0x23d   : > { %1674 = vst.msk [vmem:[#allocation3 + $0xac] sm:$0xf] %vm1179_vm4, %v1641_v8 }
 0x240   : > { %v3136_v62 = vld [vmem:[#allocation3 + $0xa8] ss:$12 sps:$4 sm:$0xff]  }
 0x244   : > { %v3134_v43 = vld [vmem:[#allocation3 + $0xac] ss:$12 sps:$4 sm:$0xff]  }
 0x245   : > { %2187 = vmatprep.mubr.bf16.mxu1 %v3134_v43 }
 0x246   : > { %2188 = vmatmul.mubr.bf16.gmra.mxu1 %v3136_v62 }
 0x296   : > { %v2944_v55 = vpop.f32.mrf.mxu1 }
 0x298   : > { %v2945_v36 = vpop.f32.mrf.mxu1 }
 0x299   : > { %v2946_v34 = vadd.f32 %v2945_v36, %v2944_v55 }
 0x29a   : > { %v2947_v49 = vpop.f32.mrf.mxu1 }
 0x29b   : > { %v2134_v26 = vadd.f32 %v2946_v34, %v3891_v7 }
 0x29c   : > { %v2948_v56 = vpop.f32.mrf.mxu1 }
 0x29d   : > { %v2949_v28 = vadd.f32 %v2948_v56, %v2947_v49  ;;  %v2231_v12 = vadd.f32 %v2230_v25, %v2134_v26 }
 0x29f   : > { %v2950_v1 = vpop.f32.mrf.mxu1  ;;  %v2137_v13 = vadd.f32 %v2949_v28, %v3891_v7  ;;  %v2293_v55 = vmax.f32 %v2231_v12, 0.0 }
 0x2a1   : > { %v2951_v32 = vpop.f32.mrf.mxu1  ;;  %v2234_v23 = vadd.f32 %v2233_v6, %v2137_v13 }
 0x2a2   : > { %v2952_v42 = vadd.f32 %v2951_v32, %v2950_v1 }
 0x2a3   : > { %v2953_v48 = vpop.f32.mrf.mxu1  ;;  %v2294_v4 = vmax.f32 %v2234_v23, 0.0 }
 0x2a4   : > { %v2142_v39 = vadd.f32 %v2952_v42, %v3891_v7 }
 0x2a5   : > { %v2954_v18 = vpop.f32.mrf.mxu1 }
 0x2a6   : > { %v2955_v15 = vadd.f32 %v2954_v18, %v2953_v48  ;;  %v2239_v44 = vadd.f32 %v3044_v19, %v2142_v39  ;;  %v2265_v19 = vpop.f32.mrf.mxu0 }
 0x2a7   : > { %v2956_v45 = vpop.f32.mrf.mxu1 }
 0x2a8   : > { %v2145_v29 = vadd.f32 %v2955_v15, %v3891_v7  ;;  %v2295_v60 = vmax.f32 %v2239_v44, 0.0  ;;  %v3921_v15 = vpop.f32.mrf.mxu0 }
 0x2a9   : > { %v2957_v50 = vpop.f32.mrf.mxu1 }
 0x2aa   : > { %v2958_v10 = vadd.f32 %v2957_v50, %v2956_v45  ;;  %v2242_v40 = vadd.f32 %v3045_v47, %v2145_v29  ;;  %v2327_v45 = vrot.slane %v2294_v4, 1  ;;  %v2329_v25 = vrot.slane %v2295_v60, 1 }
 0x2ab   : > { %v2959_v54 = vpop.f32.mrf.mxu1 }
 0x2ac   : > { %v2150_v57 = vadd.f32 %v2958_v10, %v3891_v7  ;;  %v2296_v51 = vmax.f32 %v2242_v40, 0.0 }
 0x2ad   : > { %v2960_v63 = vpop.f32.mrf.mxu1 }
 0x2ae   : > { %v2961_v20 = vadd.f32 %v2960_v63, %v2959_v54  ;;  %v2247_v21 = vadd.f32 %v2246_v41, %v2150_v57  ;;  %v2331_v1 = vrot.slane %v2296_v51, 1  ;;  %v2326_v63 = vrot.slane %v2293_v55, 1 }
 0x2b0   : > { %v2153_v37 = vadd.f32 %v2961_v20, %v3891_v7  ;;  %v2297_v2 = vmax.f32 %v2247_v21, 0.0  ;;  %v2328_v20 = vsel %vm2325_vm5, %v2326_v63, %v2327_v45 }
 0x2b1   : > { %v2372_v40 = vmax.f32 %v2293_v55, %v2328_v20 }
 0x2b2   : > { %v3900_v30 = vadd.f32 %v2249_v52, %v2153_v37  ;;  %v2333_v36 = vrot.slane %v2297_v2, 1  ;;  %v2330_v52 = vsel %vm2325_vm5, %v2327_v45, %v2329_v25 }
 0x2b3   : > { %v2373_v39 = vmax.f32 %v2294_v4, %v2330_v52 }
 0x2b4   : > { %v2298_v3 = vmax.f32 %v3900_v30, 0.0 }
 0x2b6   : > { %v2335_v32 = vrot.slane %v2298_v3, 1 }
 0x2c3   : > { %v2962_v53 = vpop.f32.mrf.mxu1 }
 0x2c5   : > { %v2963_v9 = vpop.f32.mrf.mxu1 }
 0x2c6   : > { %v2964_v27 = vadd.f32 %v2963_v9, %v2962_v53  ;;  %v2332_v9 = vsel %vm2325_vm5, %v2329_v25, %v2331_v1 }
 0x2c7   : > { %v2965_v0 = vpop.f32.mrf.mxu1  ;;  %v2374_v29 = vmax.f32 %v2295_v60, %v2332_v9 }
 0x2c8   : > { %v2158_v22 = vadd.f32 %v2964_v27, %v3891_v7 }
 0x2c9   : > { %v2966_v17 = vpop.f32.mrf.mxu1 }
 0x2ca   : > { %v2967_v61 = vadd.f32 %v2966_v17, %v2965_v0  ;;  %v3903_v16 = vadd.f32 %v3048_v5, %v2158_v22  ;;  %v2334_v5 = vsel %vm2325_vm5, %v2331_v1, %v2333_v36 }
 0x2cb   : > { %v2375_v17 = vmax.f32 %v2296_v51, %v2334_v5 }
 0x2cc   : > { %v2161_v33 = vadd.f32 %v2967_v61, %v3891_v7  ;;  %v2299_v49 = vmax.f32 %v3903_v16, 0.0 }
 0x2ce   : > { %v3907_v8 = vadd.f32 %v3049_v14, %v2161_v33  ;;  %v2337_v53 = vrot.slane %v2299_v49, 1  ;;  %v2336_v14 = vsel %vm2325_vm5, %v2333_v36, %v2335_v32 }
 0x2cf   : > { %v2376_v37 = vmax.f32 %v2297_v2, %v2336_v14 }
 0x2d0   : > { %v2300_v50 = vmax.f32 %v3907_v8, 0.0  ;;  %v2338_v13 = vsel %vm2325_vm5, %v2335_v32, %v2337_v53 }
 0x2d1   : > { %v2377_v23 = vmax.f32 %v2298_v3, %v2338_v13  ;;  %v2389_v12 = vmax.f32 %v2374_v29, %v2376_v37  ;;  %v2400_v3 = vld [vmem:[%s4014_s5] sm:$0xff] }
 0x2d2   : > { %v2339_v28 = vrot.slane %v2300_v50, 1 }
 0x2d4   : > { %v2340_v30 = vsel %vm2325_vm5, %v2337_v53, %v2339_v28 }
 0x2d5   : > { %v2378_v16 = vmax.f32 %v2299_v49, %v2340_v30 }
 0x2d7   : > { %v2391_v45 = vmax.f32 %v2376_v37, %v2378_v16 }
 0x2eb   : > { %v2968_v24 = vpop.f32.mrf.mxu1 }
 0x2ed   : > { %v2969_v11 = vpop.f32.mrf.mxu1 }
 0x2ee   : > { %v2970_v35 = vadd.f32 %v2969_v11, %v2968_v24  ;;  %v2278_v24 = vpop.f32.mrf.mxu0  ;;  %v2387_v11 = vmax.f32 %v2372_v40, %v2374_v29 }
 0x2ef   : > { %v2971_v46 = vpop.f32.mrf.mxu1 }
 0x2f0   : > { %v2166_v58 = vadd.f32 %v2970_v35, %v3891_v7  ;;  %v2401_v35 = vld [vmem:[%s4014_s5 + $0x8] sm:$0xff]  ;;  %v3936_v60 = vpop.f32.mrf.mxu0 }
 0x2f1   : > { %v2972_v43 = vpop.f32.mrf.mxu1 }
 0x2f2   : > { %v2973_v62 = vadd.f32 %v2972_v43, %v2971_v46  ;;  %v3910_v48 = vadd.f32 %v2262_v31, %v2166_v58  ;;  %v2388_v31 = vmax.f32 %v2373_v39, %v2375_v17 }
 0x2f3   : > { %v2974_v56 = vpop.f32.mrf.mxu1 }
 0x2f4   : > { %v2169_v18 = vadd.f32 %v2973_v62, %v3891_v7  ;;  %v2301_v0 = vmax.f32 %v3910_v48, 0.0  ;;  %v2414_v43 = vmul.f32 %v2401_v35, %v2388_v31  ;;  %v2390_v62 = vmax.f32 %v2375_v17, %v2377_v23 }
 0x2f5   : > { %v2975_v47 = vpop.f32.mrf.mxu1 }
 0x2f6   : > { %v3914_v54 = vadd.f32 %v2265_v19, %v2169_v18  ;;  %v2976_v6 = vadd.f32 %v2975_v47, %v2974_v56  ;;  %v2341_v61 = vrot.slane %v2301_v0, 1  ;;  %v2403_v56 = vld [vmem:[%s4014_s5 + $0x18] sm:$0xff]  ;;  %v2413_v18 = vmul.f32 %v2400_v3, %v2387_v11  ;;  %v2281_v47 = vpop.f32.mrf.mxu0 }
 0x2f7   : > { %v2977_v41 = vpop.f32.mrf.mxu1  ;;  %v2428_v53 = vsel %vm2426_vm6, %v2414_v43, 0.0  ;;  %v2409_v43 = vld [vmem:[%s4014_s5 + $0x48] sm:$0xff] }
 0x2f8   : > { %v2174_v10 = vadd.f32 %v2976_v6, %v3891_v7  ;;  %v2302_v34 = vmax.f32 %v3914_v54, 0.0  ;;  %v2342_v46 = vsel %vm2325_vm5, %v2339_v28, %v2341_v61  ;;  %v2404_v54 = vld [vmem:[%s4014_s5 + $0x20] sm:$0xff]  ;;  %v2427_v28 = vsel %vm2426_vm6, %v2413_v18, 0.0 }
 0x2f9   : > { %v2978_v42 = vpop.f32.mrf.mxu1  ;;  %v2379_v1 = vmax.f32 %v2300_v50, %v2342_v46  ;;  %v2416_v50 = vmul.f32 %v2403_v56, %v2390_v62  ;;  %v2417_v17 = vmul.f32 %v2404_v54, %v2391_v45  ;;  %v2429_v39 = vadd.f32 %v2428_v53, %v2427_v28  ;;  %v2408_v46 = vld [vmem:[%s4014_s5 + $0x40] sm:$0xff] }
 0x2fa   : > { %v3926_v57 = vadd.f32 %v3052_v38, %v2174_v10  ;;  %v2979_v27 = vadd.f32 %v2978_v42, %v2977_v41  ;;  %v2343_v38 = vrot.slane %v2302_v34, 1 }
 0x2fb   : > { %v2980_v22 = vpop.f32.mrf.mxu1  ;;  %v2392_v9 = vmax.f32 %v2377_v23, %v2379_v1 }
 0x2fc   : > { %v2303_v26 = vmax.f32 %v3926_v57, 0.0  ;;  %v2177_v21 = vadd.f32 %v2979_v27, %v3891_v7  ;;  %v2344_v55 = vsel %vm2325_vm5, %v2341_v61, %v2343_v38  ;;  %v2406_v61 = vld [vmem:[%s4014_s5 + $0x30] sm:$0xff] }
 0x2fd   : > { %v2981_v33 = vpop.f32.mrf.mxu1  ;;  %v2380_v6 = vmax.f32 %v2301_v0, %v2344_v55  ;;  %v2405_v0 = vld [vmem:[%s4014_s5 + $0x28] sm:$0xff] }
 0x2fe   : > { %v2274_v44 = vadd.f32 %v3053_v59, %v2177_v21  ;;  %v2982_v2 = vadd.f32 %v2981_v33, %v2980_v22  ;;  %v2345_v51 = vrot.slane %v2303_v26, 1  ;;  %v2402_v59 = vld [vmem:[%s4014_s5 + $0x10] sm:$0xff]  ;;  %v2418_v22 = vmul.f32 %v2405_v0, %v2392_v9 }
 0x2ff   : > { %v2983_v4 = vpop.f32.mrf.mxu1  ;;  %v2415_v19 = vmul.f32 %v2402_v59, %v2389_v12  ;;  %v2393_v57 = vmax.f32 %v2378_v16, %v2380_v6 }
 0x300   : > { %v2304_v58 = vmax.f32 %v2274_v44, 0.0  ;;  %v2182_v8 = vadd.f32 %v2982_v2, %v3891_v7  ;;  %v2346_v25 = vsel %vm2325_vm5, %v2343_v38, %v2345_v51  ;;  %v2407_v38 = vld [vmem:[%s4014_s5 + $0x38] sm:$0xff]  ;;  %v2434_v44 = vsel %vm2426_vm6, %v2417_v17, 0.0 }
 0x301   : > { %v2984_v49 = vpop.f32.mrf.mxu1  ;;  %v2381_v10 = vmax.f32 %v2302_v34, %v2346_v25  ;;  %v2430_v42 = vsel %vm2426_vm6, %v2415_v19, 0.0  ;;  %v2432_v34 = vsel %vm2426_vm6, %v2416_v50, 0.0  ;;  %v2419_v33 = vmul.f32 %v2406_v61, %v2393_v57 }
 0x302   : > { %v2347_v36 = vrot.slane %v2304_v58, 1  ;;  %v2985_v32 = vadd.f32 %v2984_v49, %v2983_v4  ;;  %v2279_v48 = vadd.f32 %v2278_v24, %v2182_v8  ;;  %v2431_v23 = vadd.f32 %v2430_v42, %v2429_v39 }
 0x303   : > { %v2394_v40 = vmax.f32 %v2379_v1, %v2381_v10  ;;  %v2436_v4 = vsel %vm2426_vm6, %v2418_v22, 0.0 }
 0x304   : > { %v2305_v63 = vmax.f32 %v2279_v48, 0.0  ;;  %v2185_v5 = vadd.f32 %v2985_v32, %v3891_v7  ;;  %v2348_v41 = vsel %vm2325_vm5, %v2345_v51, %v2347_v36  ;;  %v2433_v2 = vadd.f32 %v2432_v34, %v2431_v23  ;;  %v2461_v23 = vld [vmem:[#allocation4] sm:$0x1] }
 0x305   : > { %v2382_v37 = vmax.f32 %v2303_v26, %v2348_v41  ;;  %v2420_v59 = vmul.f32 %v2407_v38, %v2394_v40  ;;  %v3149_v40 = vmov 0  }
 0x306   : > { %v2349_v14 = vrot.slane %v2305_v63, 1  ;;  %v2282_v20 = vadd.f32 %v2281_v47, %v2185_v5  ;;  %v2986_v52 = vpop.f32.mrf.mxu1  ;;  %v2435_v8 = vadd.f32 %v2434_v44, %v2433_v2  ;;  %v2411_v5 = vld [vmem:[%s4014_s5 + $0x58] sm:$0xff]  ;;  %3071 = vset.pattern.permute.xlu1 %v3149_v40  ;;  %3072 = vset.pattern.permute.xlu0 %v3149_v40 }
 0x307   : > { %v2395_v35 = vmax.f32 %v2380_v6, %v2382_v37  ;;  %v2440_v19 = vsel %vm2426_vm6, %v2420_v59, 0.0 }
 0x308   : > { %v2350_v27 = vsel %vm2325_vm5, %v2347_v36, %v2349_v14  ;;  %v2306_v29 = vmax.f32 %v2282_v20, 0.0  ;;  %v2987_v13 = vpop.f32.mrf.mxu1  ;;  %v2438_v36 = vsel %vm2426_vm6, %v2419_v33, 0.0  ;;  %v2437_v1 = vadd.f32 %v2436_v4, %v2435_v8 }
 0x309   : > { %v2988_v21 = vadd.f32 %v2987_v13, %v2986_v52  ;;  %v2383_v24 = vmax.f32 %v2304_v58, %v2350_v27  ;;  %v2421_v56 = vmul.f32 %v2408_v46, %v2395_v35  ;;  %v2412_v52 = vld [vmem:[%s4014_s5 + $0x60] sm:$0xff] }
 0x30a   : > { %v2351_v30 = vrot.slane %v2306_v29, 1  ;;  %v2989_v31 = vpop.f32.mrf.mxu1  ;;  %v2439_v45 = vadd.f32 %v2438_v36, %v2437_v1 }
 0x30b   : > { %v2190_v26 = vadd.f32 %v2988_v21, %v3891_v7  ;;  %v2396_v3 = vmax.f32 %v2381_v10, %v2383_v24  ;;  %v2442_v6 = vsel %vm2426_vm6, %v2421_v56, 0.0 }
 0x30c   : > { %v2352_v11 = vsel %vm2325_vm5, %v2349_v14, %v2351_v30  ;;  %v2990_v12 = vpop.f32.mrf.mxu1  ;;  %v2441_v53 = vadd.f32 %v2440_v19, %v2439_v45 }
 0x30d   : > { %v2384_v16 = vmax.f32 %v2305_v63, %v2352_v11  ;;  %v2287_v51 = vadd.f32 %v3921_v15, %v2190_v26  ;;  %v2991_v58 = vadd.f32 %v2990_v12, %v2989_v31  ;;  %v2410_v15 = vld [vmem:[%s4014_s5 + $0x50] sm:$0xff]  ;;  %v2422_v18 = vmul.f32 %v2409_v43, %v2396_v3 }
 0x30e   : > { %v2443_v9 = vadd.f32 %v2442_v6, %v2441_v53 }
 0x30f   : > { %v2307_v62 = vmax.f32 %v2287_v51, 0.0  ;;  %v2193_v55 = vadd.f32 %v2991_v58, %v3891_v7  ;;  %v2397_v49 = vmax.f32 %v2382_v37, %v2384_v16  ;;  %v2444_v50 = vsel %vm2426_vm6, %v2422_v18, 0.0 }
 0x310   : > { %v2445_v28 = vadd.f32 %v2444_v50, %v2443_v9 }
 0x311   : > { %v2353_v32 = vrot.slane %v2307_v62, 1  ;;  %v2290_v48 = vadd.f32 %v3936_v60, %v2193_v55  ;;  %v2423_v7 = vmul.f32 %v2410_v15, %v2397_v49 }
 0x313   : > { %v2354_v25 = vsel %vm2325_vm5, %v2351_v30, %v2353_v32  ;;  %v2308_v47 = vmax.f32 %v2290_v48, 0.0  ;;  %v2446_v20 = vsel %vm2426_vm6, %v2423_v7, 0.0  ;;  %v2464_v30 = vlaneseq }
 0x314   : > { %v2385_v54 = vmax.f32 %v2306_v29, %v2354_v25  ;;  %v2447_v0 = vadd.f32 %v2446_v20, %v2445_v28 }
 0x315   : > { %v2355_v63 = vrot.slane %v2308_v47, 1  ;;  %v2465_v31 = vshrl.u32 %v2464_v30, 7 }
 0x316   : > { %v2398_v60 = vmax.f32 %v2383_v24, %v2385_v54 }
 0x317   : > { %v2356_v41 = vsel %vm2325_vm5, %v2353_v32, %v2355_v63  ;;  %v2466_v38 = vsub.s32 0, %v2465_v31 }
 0x318   : > { %v2386_v14 = vmax.f32 %v2307_v62, %v2356_v41  ;;  %v2424_v10 = vmul.f32 %v2411_v5, %v2398_v60 }
 0x31a   : > { %v2399_v42 = vmax.f32 %v2384_v16, %v2386_v14  ;;  %v2448_v17 = vsel %vm2426_vm6, %v2424_v10, 0.0 }
 0x31b   : > { %v2449_v27 = vadd.f32 %v2448_v17, %v2447_v0 }
 0x31c   : > { %v2425_v57 = vmul.f32 %v2412_v52, %v2399_v42 }
 0x31e   : > { %v2450_v29 = vsel %vm2426_vm6, %v2425_v57, 0.0 }
 0x31f   : > { %v2451_v37 = vadd.f32 %v2450_v29, %v2449_v27 }
 0x321   : > { %v2452_v13 = vrot.slane %v2451_v37, 4 }
 0x323   : > { %v2453_v39 = vadd.f32 %v2452_v13, %v2451_v37 }
 0x325   : > { %v2454_v34 = vrot.slane %v2453_v39, 2 }
 0x327   : > { %v2455_v61 = vadd.f32 %v2454_v34, %v2453_v39 }
 0x329   : > { %v2456_v21 = vrot.slane %v2455_v61, 1 }
 0x32b   : > { %v2457_v22 = vadd.f32 %v2456_v21, %v2455_v61 }
 0x32d   : > { %v2458_v24 = vsel %vm2426_vm6, %v2457_v22, 0.0 }
 0x32e   : > { %2459 = vadd.xlane.f32.xlu0 %v2458_v24 }
 0x3b7   : > { %v2460_v26 = vpop.xlane.xlu0 %2459 }
 0x3b8   : > { %v2462_v44 = vadd.f32 %v2461_v23, %v2460_v26 }
 0x3ba   : > { %v2467_v33 = vrot.slane %v2462_v44, %v2466_v38 }
 0x3bc   : > { %2469 = vperm.xlu1 %3071, %v2467_v33  }
 0x437   : > { %v2470_v11 = vpop.permute.xlu1 %2469 }
 0x438   : > { %2472 = vst [vmem:[%s280_s22] sm:$0xff] %v2470_v11 }
 0x439 PF: > { %s19_s26 = sadd.s32 1, %s3143_s26  }
 0x43a   : > { %p16_p5 = scmp.ge.s32.totalorder %s19_s26, 4  }
 0x43c   :  { %18 = sbr.rel (!%p16_p5) target bundleno = 3 (0x3), region = 78 }

</bundles_post_ra>
